<compile_context>
chip_gen: v7x
topology: tpu7x:2x2x1
jax: 0.10.0
libtpu: 0.0.40
codegen_flags: <defaults>
</compile_context>

<pallas_src>
import functools

import jax
import jax.numpy as jnp
from jax.experimental import pallas as pl
from jax.experimental.pallas import tpu as pltpu


# ---------------------------------------------------------------------------
# Kernel: whole recurrence in one invocation, state carried in registers.
# ---------------------------------------------------------------------------
def _sine_rnn_kernel(seq_ref, w1_ref, u1_ref, b1_ref,
                     wu2_ref, b2_ref, u1fb_ref, b1fb_ref,
                     wl_ref, bl_ref,
                     out_ref):
    B, T = seq_ref.shape
    H = u1_ref.shape[0]
    G = 4 * H
    steps = out_ref.shape[1]

    # ---- hoist all inputs into vregs once ----
    seq = seq_ref[...]                      # (B, T)
    w1 = w1_ref[...]                        # (1, 4H)   cell1 input weights (i|f|o|c)
    u1 = u1_ref[...]                        # (H, 4H)
    b1 = b1_ref[...]                        # (1, 4H)   combined W+U biases
    wu2 = wu2_ref[...]                      # (2H, 4H)  [W2; U2] fused cell-2 RHS
    b2 = b2_ref[...]                        # (1, 4H)
    u1fb = u1fb_ref[...]                    # (2H, 4H)  [U1; wl.T @ W1] predict-phase RHS
    b1fb = b1fb_ref[...]                    # (1, 4H)   b1 + bl*w1
    wl = wl_ref[...]                        # (1, H)    linear head weight row
    bl = bl_ref[...]                        # (1, 1)

    # Hoisted broadcasts (not CSE'd if left inside the unrolled loop).
    b2_b = jnp.broadcast_to(b2, (B, G))
    b1fb_b = jnp.broadcast_to(b1fb, (B, G))
    wl_b = jnp.broadcast_to(wl, (B, H))
    bl_b = jnp.broadcast_to(bl, (B, 1))

    def lstm_cell(g, c_prev):
        # Full-width nonlinearities: (B,4H) fits a single vreg push, so apply
        # once and lane-slice afterwards.  sigmoid(x) = 0.5*tanh(0.5*x)+0.5
        # keeps sigmoid to one EUP op (VPU fixup rides in free VALU slots).
        sg = 0.5 * jnp.tanh(0.5 * g) + 0.5      # sigmoid of all gates
        tg = jnp.tanh(g)                        # tanh of all gates (need c-slice)
        i = sg[:, 0 * H:1 * H]
        f = sg[:, 1 * H:2 * H]
        o = sg[:, 2 * H:3 * H]
        cb = tg[:, 3 * H:4 * H]
        c = f * c_prev + i * cb
        h = o * jnp.tanh(c)
        return h, c

    # State-independent teacher-forced input contribution, hoisted off the
    # recurrence chain (lane extract + broadcast happen up front).
    g1_in = [seq[:, t:t + 1] * w1 + b1 for t in range(T)]

    zeros = jnp.zeros((B, H), jnp.float32)
    h1, c1, h2, c2 = zeros, zeros, zeros, zeros

    # Trace-time-unrolled recurrence (steps is small & static).
    for t in range(steps):
        if t < T:
            # Teacher forcing: input term precomputed; one K=H dot.
            g1 = g1_in[t] + jnp.dot(h1, u1, preferred_element_type=jnp.float32)
        else:
            # Predict phase: feedback x = o = h2@wl.T + bl folded into cell 1:
            #   g1 = h1@U1 + h2@(wl.T@W1) + (b1 + bl*w1)
            # as a single fused K=2H dot -> no lane-reduce on the critical path.
            h12 = jnp.concatenate([h1, h2], axis=1)                  # (B, 2H)
            g1 = jnp.dot(h12, u1fb, preferred_element_type=jnp.float32) + b1fb_b
        h1, c1 = lstm_cell(g1, c1)

        # LSTM cell 2: fused [h1|h2] @ [W2; U2] -> single K=2H dot.
        h12 = jnp.concatenate([h1, h2], axis=1)                      # (B, 2H)
        g2 = jnp.dot(h12, wu2, preferred_element_type=jnp.float32) + b2_b
        h2, c2 = lstm_cell(g2, c2)

        # Linear head (out_features == 1): lane reduce; only feeds the output
        # store now, never the recurrence, so it is off the critical chain.
        o = jnp.sum(h2 * wl_b, axis=1, keepdims=True) + bl_b         # (B, 1)

        # Each column written exactly once; stores sit in otherwise-idle slots.
        out_ref[:, t:t + 1] = o


# ---------------------------------------------------------------------------
# Wrapper.  Fused matrices are built at trace time (one-off, not per step).
# ---------------------------------------------------------------------------
@functools.partial(jax.jit, static_argnames=("predict",))
def sine_rnn_forward(seq, params, predict=0):
    """seq: (B, T) float32 -> (B, T + predict) float32."""
    B, T = seq.shape
    steps = T + predict

    w1, u1, b1 = params["w1"], params["u1"], params["b1"]
    w2, u2, b2 = params["w2"], params["u2"], params["b2"]
    wl, bl = params["wl"], params["bl"]

    wu2 = jnp.concatenate([w2, u2], axis=0)          # (2H, 4H)  cell-2 fused RHS
    w_fb = wl.T @ w1                                 # (H, 4H)   head-feedback fold
    u1fb = jnp.concatenate([u1, w_fb], axis=0)       # (2H, 4H)  predict-phase RHS
    b1fb = b1 + bl * w1                              # (1, 4H)

    vmem = lambda: pl.BlockSpec(memory_space=pltpu.MemorySpace.VMEM)
    return pl.pallas_call(
        _sine_rnn_kernel,
        out_shape=jax.ShapeDtypeStruct((B, steps), jnp.float32),
        in_specs=[vmem() for _ in range(10)],
        out_specs=vmem(),
    )(seq, w1, u1, b1, wu2, b2, u1fb, b1fb, wl, bl)


# ---------------------------------------------------------------------------
# Deterministic parameter init (mimics nn.Linear's U(-1/sqrt(fan_in), +...)),
# gate Linears packed along the output axis in order i|f|o|c (matches the
# bundled reference; NOTE: torch.nn.LSTMCell would pack i|f|g|o).  The two
# bias components (W-side and U-side) of each cell use independent keys.
# ---------------------------------------------------------------------------
def init_params(key, in_features=1, H=32):
    ks = jax.random.split(key, 10)

    def u(k, shape, fan_in):
        bound = 1.0 / jnp.sqrt(jnp.float32(fan_in))
        return jax.random.uniform(k, shape, jnp.float32, -bound, bound)

    return {
        "w1": u(ks[0], (in_features, 4 * H), in_features),
        "u1": u(ks[1], (H, 4 * H), H),
        "b1": u(ks[2], (1, 4 * H), in_features) + u(ks[3], (1, 4 * H), H),
        "w2": u(ks[4], (H, 4 * H), H),
        "u2": u(ks[5], (H, 4 * H), H),
        "b2": u(ks[6], (1, 4 * H), H) + u(ks[7], (1, 4 * H), H),
        "wl": u(ks[8], (1, H), H),
        "bl": u(ks[9], (1, 1), H),
    }


# Pure-JAX reference (same math as the PyTorch module; unfused, explicit
# head feedback, jax.nn.sigmoid) — independent of the kernel's rewrites.
def reference_forward(seq, params, predict=0):
    B, T = seq.shape
    H = params["u1"].shape[0]

    def cell(x, h, c, W, U, b):
        g = x @ W + h @ U + b
        i = jax.nn.sigmoid(g[:, 0 * H:1 * H])
        f = jax.nn.sigmoid(g[:, 1 * H:2 * H])
        o = jax.nn.sigmoid(g[:, 2 * H:3 * H])
        cb = jnp.tanh(g[:, 3 * H:4 * H])
        c2 = f * c + i * cb
        return o * jnp.tanh(c2), c2

    h1 = c1 = h2 = c2 = jnp.zeros((B, H), jnp.float32)
    o = None
    outs = []
    for t in range(T + predict):
        x = seq[:, t:t + 1] if t < T else o
        h1, c1 = cell(x, h1, c1, params["w1"], params["u1"], params["b1"])
        h2, c2 = cell(h1, h2, c2, params["w2"], params["u2"], params["b2"])
        o = h2 @ params["wl"].T + params["bl"]
        outs.append(o)
    return jnp.concatenate(outs, axis=1)


if __name__ == "__main__":
    B, T, H, PREDICT = 4, 8, 32, 4
    key = jax.random.PRNGKey(0)
    k_seq, k_par = jax.random.split(key)

    seq = jnp.sin(jnp.linspace(0.0, 3.0, B * T)).reshape(B, T).astype(jnp.float32)
    seq = seq + 0.01 * jax.random.normal(k_seq, (B, T), jnp.float32)
    params = init_params(k_par, in_features=1, H=H)

    out = jax.block_until_ready(sine_rnn_forward(seq, params, predict=PREDICT))
    ref = reference_forward(seq, params, predict=PREDICT)

    assert out.shape == (B, T + PREDICT), out.shape
    err = float(jnp.max(jnp.abs(out - ref)))
    # f32 rounding differs slightly between Mosaic (fused K=64 dots, tanh-based
    # sigmoid, head-feedback fold) and the unfused XLA reference over the
    # 12-step recurrence; a real bug would be orders of magnitude larger.
    assert err < 5e-3, f"max abs err = {err}"
    print("KERNEL_OK")
</pallas_src>

<mosaic_0001>
module attributes {stable_mosaic.version = 11 : i64} {
  func.func @_sine_rnn_kernel(%arg0: memref<4x8xf32, #tpu.memory_space<vmem>>, %arg1: memref<1x128xf32, #tpu.memory_space<vmem>>, %arg2: memref<32x128xf32, #tpu.memory_space<vmem>>, %arg3: memref<1x128xf32, #tpu.memory_space<vmem>>, %arg4: memref<64x128xf32, #tpu.memory_space<vmem>>, %arg5: memref<1x128xf32, #tpu.memory_space<vmem>>, %arg6: memref<64x128xf32, #tpu.memory_space<vmem>>, %arg7: memref<1x128xf32, #tpu.memory_space<vmem>>, %arg8: memref<1x32xf32, #tpu.memory_space<vmem>>, %arg9: memref<1x1xf32, #tpu.memory_space<vmem>>, %arg10: memref<4x12xf32, #tpu.memory_space<vmem>>) attributes {dimension_semantics = [], scalar_prefetch = 0 : i64, scratch_operands = 0 : i64, tpu.core_type = #tpu.core_type<tc>} {
    %c0 = arith.constant 0 : index
    %c0_0 = arith.constant 0 : index
    %0 = vector.load %arg0[%c0, %c0_0] : memref<4x8xf32, #tpu.memory_space<vmem>>, vector<4x8xf32>
    %c0_1 = arith.constant 0 : index
    %c0_2 = arith.constant 0 : index
    %1 = vector.load %arg1[%c0_1, %c0_2] : memref<1x128xf32, #tpu.memory_space<vmem>>, vector<1x128xf32>
    %c0_3 = arith.constant 0 : index
    %c0_4 = arith.constant 0 : index
    %2 = vector.load %arg2[%c0_3, %c0_4] : memref<32x128xf32, #tpu.memory_space<vmem>>, vector<32x128xf32>
    %c0_5 = arith.constant 0 : index
    %c0_6 = arith.constant 0 : index
    %3 = vector.load %arg3[%c0_5, %c0_6] : memref<1x128xf32, #tpu.memory_space<vmem>>, vector<1x128xf32>
    %c0_7 = arith.constant 0 : index
    %c0_8 = arith.constant 0 : index
    %4 = vector.load %arg4[%c0_7, %c0_8] : memref<64x128xf32, #tpu.memory_space<vmem>>, vector<64x128xf32>
    %c0_9 = arith.constant 0 : index
    %c0_10 = arith.constant 0 : index
    %5 = vector.load %arg5[%c0_9, %c0_10] : memref<1x128xf32, #tpu.memory_space<vmem>>, vector<1x128xf32>
    %c0_11 = arith.constant 0 : index
    %c0_12 = arith.constant 0 : index
    %6 = vector.load %arg6[%c0_11, %c0_12] : memref<64x128xf32, #tpu.memory_space<vmem>>, vector<64x128xf32>
    %c0_13 = arith.constant 0 : index
    %c0_14 = arith.constant 0 : index
    %7 = vector.load %arg7[%c0_13, %c0_14] : memref<1x128xf32, #tpu.memory_space<vmem>>, vector<1x128xf32>
    %c0_15 = arith.constant 0 : index
    %c0_16 = arith.constant 0 : index
    %8 = vector.load %arg8[%c0_15, %c0_16] : memref<1x32xf32, #tpu.memory_space<vmem>>, vector<1x32xf32>
    %c0_17 = arith.constant 0 : index
    %c0_18 = arith.constant 0 : index
    %9 = vector.load %arg9[%c0_17, %c0_18] : memref<1x1xf32, #tpu.memory_space<vmem>>, vector<1x1xf32>
    %10 = vector.shape_cast %5 : vector<1x128xf32> to vector<1x128xf32>
    %11 = vector.broadcast %10 : vector<1x128xf32> to vector<4x128xf32>
    %12 = vector.shape_cast %7 : vector<1x128xf32> to vector<1x128xf32>
    %13 = vector.broadcast %12 : vector<1x128xf32> to vector<4x128xf32>
    %14 = vector.shape_cast %8 : vector<1x32xf32> to vector<1x32xf32>
    %15 = vector.broadcast %14 : vector<1x32xf32> to vector<4x32xf32>
    %16 = vector.shape_cast %9 : vector<1x1xf32> to vector<1x1xf32>
    %17 = vector.broadcast %16 : vector<1x1xf32> to vector<4x1xf32>
    %18 = vector.extract_strided_slice %0 {offsets = [0, 0], sizes = [4, 1], strides = [1, 1]} : vector<4x8xf32> to vector<4x1xf32>
    %19 = vector.broadcast %18 : vector<4x1xf32> to vector<4x128xf32>
    %20 = vector.broadcast %1 : vector<1x128xf32> to vector<4x128xf32>
    %21 = arith.mulf %19, %20 : vector<4x128xf32>
    %22 = vector.broadcast %3 : vector<1x128xf32> to vector<4x128xf32>
    %23 = arith.addf %21, %22 : vector<4x128xf32>
    %24 = vector.extract_strided_slice %0 {offsets = [0, 1], sizes = [4, 1], strides = [1, 1]} : vector<4x8xf32> to vector<4x1xf32>
    %25 = vector.broadcast %24 : vector<4x1xf32> to vector<4x128xf32>
    %26 = vector.broadcast %1 : vector<1x128xf32> to vector<4x128xf32>
    %27 = arith.mulf %25, %26 : vector<4x128xf32>
    %28 = vector.broadcast %3 : vector<1x128xf32> to vector<4x128xf32>
    %29 = arith.addf %27, %28 : vector<4x128xf32>
    %30 = vector.extract_strided_slice %0 {offsets = [0, 2], sizes = [4, 1], strides = [1, 1]} : vector<4x8xf32> to vector<4x1xf32>
    %31 = vector.broadcast %30 : vector<4x1xf32> to vector<4x128xf32>
    %32 = vector.broadcast %1 : vector<1x128xf32> to vector<4x128xf32>
    %33 = arith.mulf %31, %32 : vector<4x128xf32>
    %34 = vector.broadcast %3 : vector<1x128xf32> to vector<4x128xf32>
    %35 = arith.addf %33, %34 : vector<4x128xf32>
    %36 = vector.extract_strided_slice %0 {offsets = [0, 3], sizes = [4, 1], strides = [1, 1]} : vector<4x8xf32> to vector<4x1xf32>
    %37 = vector.broadcast %36 : vector<4x1xf32> to vector<4x128xf32>
    %38 = vector.broadcast %1 : vector<1x128xf32> to vector<4x128xf32>
    %39 = arith.mulf %37, %38 : vector<4x128xf32>
    %40 = vector.broadcast %3 : vector<1x128xf32> to vector<4x128xf32>
    %41 = arith.addf %39, %40 : vector<4x128xf32>
    %42 = vector.extract_strided_slice %0 {offsets = [0, 4], sizes = [4, 1], strides = [1, 1]} : vector<4x8xf32> to vector<4x1xf32>
    %43 = vector.broadcast %42 : vector<4x1xf32> to vector<4x128xf32>
    %44 = vector.broadcast %1 : vector<1x128xf32> to vector<4x128xf32>
    %45 = arith.mulf %43, %44 : vector<4x128xf32>
    %46 = vector.broadcast %3 : vector<1x128xf32> to vector<4x128xf32>
    %47 = arith.addf %45, %46 : vector<4x128xf32>
    %48 = vector.extract_strided_slice %0 {offsets = [0, 5], sizes = [4, 1], strides = [1, 1]} : vector<4x8xf32> to vector<4x1xf32>
    %49 = vector.broadcast %48 : vector<4x1xf32> to vector<4x128xf32>
    %50 = vector.broadcast %1 : vector<1x128xf32> to vector<4x128xf32>
    %51 = arith.mulf %49, %50 : vector<4x128xf32>
    %52 = vector.broadcast %3 : vector<1x128xf32> to vector<4x128xf32>
    %53 = arith.addf %51, %52 : vector<4x128xf32>
    %54 = vector.extract_strided_slice %0 {offsets = [0, 6], sizes = [4, 1], strides = [1, 1]} : vector<4x8xf32> to vector<4x1xf32>
    %55 = vector.broadcast %54 : vector<4x1xf32> to vector<4x128xf32>
    %56 = vector.broadcast %1 : vector<1x128xf32> to vector<4x128xf32>
    %57 = arith.mulf %55, %56 : vector<4x128xf32>
    %58 = vector.broadcast %3 : vector<1x128xf32> to vector<4x128xf32>
    %59 = arith.addf %57, %58 : vector<4x128xf32>
    %60 = vector.extract_strided_slice %0 {offsets = [0, 7], sizes = [4, 1], strides = [1, 1]} : vector<4x8xf32> to vector<4x1xf32>
    %61 = vector.broadcast %60 : vector<4x1xf32> to vector<4x128xf32>
    %62 = vector.broadcast %1 : vector<1x128xf32> to vector<4x128xf32>
    %63 = arith.mulf %61, %62 : vector<4x128xf32>
    %64 = vector.broadcast %3 : vector<1x128xf32> to vector<4x128xf32>
    %65 = arith.addf %63, %64 : vector<4x128xf32>
    %cst = arith.constant 0.000000e+00 : f32
    %66 = vector.broadcast %cst : f32 to vector<4x32xf32>
    %cst_19 = arith.constant dense<0.000000e+00> : vector<4x128xf32>
    %67 = tpu.matmul %66, %2, %cst_19 {dimension_numbers = #tpu.dot_dimension_numbers<[1], [0], [0], [1], [0, 0, 1, 1], [], []>} : vector<4x32xf32>, vector<32x128xf32>, vector<4x128xf32> -> vector<4x128xf32>
    %68 = arith.addf %23, %67 : vector<4x128xf32>
    %cst_20 = arith.constant 5.000000e-01 : f32
    %69 = vector.broadcast %cst_20 : f32 to vector<4x128xf32>
    %70 = arith.mulf %69, %68 : vector<4x128xf32>
    %71 = math.tanh %70 : vector<4x128xf32>
    %cst_21 = arith.constant 5.000000e-01 : f32
    %72 = vector.broadcast %cst_21 : f32 to vector<4x128xf32>
    %73 = arith.mulf %72, %71 : vector<4x128xf32>
    %cst_22 = arith.constant 5.000000e-01 : f32
    %74 = vector.broadcast %cst_22 : f32 to vector<4x128xf32>
    %75 = arith.addf %73, %74 : vector<4x128xf32>
    %76 = math.tanh %68 : vector<4x128xf32>
    %77 = vector.extract_strided_slice %75 {offsets = [0, 0], sizes = [4, 32], strides = [1, 1]} : vector<4x128xf32> to vector<4x32xf32>
    %78 = vector.extract_strided_slice %75 {offsets = [0, 32], sizes = [4, 32], strides = [1, 1]} : vector<4x128xf32> to vector<4x32xf32>
    %79 = vector.extract_strided_slice %75 {offsets = [0, 64], sizes = [4, 32], strides = [1, 1]} : vector<4x128xf32> to vector<4x32xf32>
    %80 = vector.extract_strided_slice %76 {offsets = [0, 96], sizes = [4, 32], strides = [1, 1]} : vector<4x128xf32> to vector<4x32xf32>
    %81 = arith.mulf %78, %66 : vector<4x32xf32>
    %82 = arith.mulf %77, %80 : vector<4x32xf32>
    %83 = arith.addf %81, %82 : vector<4x32xf32>
    %84 = math.tanh %83 : vector<4x32xf32>
    %85 = arith.mulf %79, %84 : vector<4x32xf32>
    %86 = tpu.concatenate %85, %66 in 1 : vector<4x32xf32>, vector<4x32xf32> -> vector<4x64xf32>
    %cst_23 = arith.constant dense<0.000000e+00> : vector<4x128xf32>
    %87 = tpu.matmul %86, %4, %cst_23 {dimension_numbers = #tpu.dot_dimension_numbers<[1], [0], [0], [1], [0, 0, 1, 1], [], []>} : vector<4x64xf32>, vector<64x128xf32>, vector<4x128xf32> -> vector<4x128xf32>
    %88 = arith.addf %87, %11 : vector<4x128xf32>
    %cst_24 = arith.constant 5.000000e-01 : f32
    %89 = vector.broadcast %cst_24 : f32 to vector<4x128xf32>
    %90 = arith.mulf %89, %88 : vector<4x128xf32>
    %91 = math.tanh %90 : vector<4x128xf32>
    %cst_25 = arith.constant 5.000000e-01 : f32
    %92 = vector.broadcast %cst_25 : f32 to vector<4x128xf32>
    %93 = arith.mulf %92, %91 : vector<4x128xf32>
    %cst_26 = arith.constant 5.000000e-01 : f32
    %94 = vector.broadcast %cst_26 : f32 to vector<4x128xf32>
    %95 = arith.addf %93, %94 : vector<4x128xf32>
    %96 = math.tanh %88 : vector<4x128xf32>
    %97 = vector.extract_strided_slice %95 {offsets = [0, 0], sizes = [4, 32], strides = [1, 1]} : vector<4x128xf32> to vector<4x32xf32>
    %98 = vector.extract_strided_slice %95 {offsets = [0, 32], sizes = [4, 32], strides = [1, 1]} : vector<4x128xf32> to vector<4x32xf32>
    %99 = vector.extract_strided_slice %95 {offsets = [0, 64], sizes = [4, 32], strides = [1, 1]} : vector<4x128xf32> to vector<4x32xf32>
    %100 = vector.extract_strided_slice %96 {offsets = [0, 96], sizes = [4, 32], strides = [1, 1]} : vector<4x128xf32> to vector<4x32xf32>
    %101 = arith.mulf %98, %66 : vector<4x32xf32>
    %102 = arith.mulf %97, %100 : vector<4x32xf32>
    %103 = arith.addf %101, %102 : vector<4x32xf32>
    %104 = math.tanh %103 : vector<4x32xf32>
    %105 = arith.mulf %99, %104 : vector<4x32xf32>
    %106 = arith.mulf %105, %15 : vector<4x32xf32>
    %cst_27 = arith.constant dense<0.000000e+00> : vector<4xf32>
    %107 = vector.multi_reduction <add>, %106, %cst_27 [1] : vector<4x32xf32> to vector<4xf32>
    %108 = vector.shape_cast %107 : vector<4xf32> to vector<4x1xf32>
    %109 = arith.addf %108, %17 : vector<4x1xf32>
    %c0_28 = arith.constant 0 : index
    %c0_29 = arith.constant 0 : index
    %110 = vector.load %arg10[%c0_28, %c0_29] : memref<4x12xf32, #tpu.memory_space<vmem>>, vector<4x1xf32>
    tpu.vector_store %arg10[%c0_28, %c0_29], %109 {strides = array<i32>} : memref<4x12xf32, #tpu.memory_space<vmem>>, vector<4x1xf32>,
    %cst_30 = arith.constant dense<0.000000e+00> : vector<4x128xf32>
    %111 = tpu.matmul %85, %2, %cst_30 {dimension_numbers = #tpu.dot_dimension_numbers<[1], [0], [0], [1], [0, 0, 1, 1], [], []>} : vector<4x32xf32>, vector<32x128xf32>, vector<4x128xf32> -> vector<4x128xf32>
    %112 = arith.addf %29, %111 : vector<4x128xf32>
    %cst_31 = arith.constant 5.000000e-01 : f32
    %113 = vector.broadcast %cst_31 : f32 to vector<4x128xf32>
    %114 = arith.mulf %113, %112 : vector<4x128xf32>
    %115 = math.tanh %114 : vector<4x128xf32>
    %cst_32 = arith.constant 5.000000e-01 : f32
    %116 = vector.broadcast %cst_32 : f32 to vector<4x128xf32>
    %117 = arith.mulf %116, %115 : vector<4x128xf32>
    %cst_33 = arith.constant 5.000000e-01 : f32
    %118 = vector.broadcast %cst_33 : f32 to vector<4x128xf32>
    %119 = arith.addf %117, %118 : vector<4x128xf32>
    %120 = math.tanh %112 : vector<4x128xf32>
    %121 = vector.extract_strided_slice %119 {offsets = [0, 0], sizes = [4, 32], strides = [1, 1]} : vector<4x128xf32> to vector<4x32xf32>
    %122 = vector.extract_strided_slice %119 {offsets = [0, 32], sizes = [4, 32], strides = [1, 1]} : vector<4x128xf32> to vector<4x32xf32>
    %123 = vector.extract_strided_slice %119 {offsets = [0, 64], sizes = [4, 32], strides = [1, 1]} : vector<4x128xf32> to vector<4x32xf32>
    %124 = vector.extract_strided_slice %120 {offsets = [0, 96], sizes = [4, 32], strides = [1, 1]} : vector<4x128xf32> to vector<4x32xf32>
    %125 = arith.mulf %122, %83 : vector<4x32xf32>
    %126 = arith.mulf %121, %124 : vector<4x32xf32>
    %127 = arith.addf %125, %126 : vector<4x32xf32>
    %128 = math.tanh %127 : vector<4x32xf32>
    %129 = arith.mulf %123, %128 : vector<4x32xf32>
    %130 = tpu.concatenate %129, %105 in 1 : vector<4x32xf32>, vector<4x32xf32> -> vector<4x64xf32>
    %cst_34 = arith.constant dense<0.000000e+00> : vector<4x128xf32>
    %131 = tpu.matmul %130, %4, %cst_34 {dimension_numbers = #tpu.dot_dimension_numbers<[1], [0], [0], [1], [0, 0, 1, 1], [], []>} : vector<4x64xf32>, vector<64x128xf32>, vector<4x128xf32> -> vector<4x128xf32>
    %132 = arith.addf %131, %11 : vector<4x128xf32>
    %cst_35 = arith.constant 5.000000e-01 : f32
    %133 = vector.broadcast %cst_35 : f32 to vector<4x128xf32>
    %134 = arith.mulf %133, %132 : vector<4x128xf32>
    %135 = math.tanh %134 : vector<4x128xf32>
    %cst_36 = arith.constant 5.000000e-01 : f32
    %136 = vector.broadcast %cst_36 : f32 to vector<4x128xf32>
    %137 = arith.mulf %136, %135 : vector<4x128xf32>
    %cst_37 = arith.constant 5.000000e-01 : f32
    %138 = vector.broadcast %cst_37 : f32 to vector<4x128xf32>
    %139 = arith.addf %137, %138 : vector<4x128xf32>
    %140 = math.tanh %132 : vector<4x128xf32>
    %141 = vector.extract_strided_slice %139 {offsets = [0, 0], sizes = [4, 32], strides = [1, 1]} : vector<4x128xf32> to vector<4x32xf32>
    %142 = vector.extract_strided_slice %139 {offsets = [0, 32], sizes = [4, 32], strides = [1, 1]} : vector<4x128xf32> to vector<4x32xf32>
    %143 = vector.extract_strided_slice %139 {offsets = [0, 64], sizes = [4, 32], strides = [1, 1]} : vector<4x128xf32> to vector<4x32xf32>
    %144 = vector.extract_strided_slice %140 {offsets = [0, 96], sizes = [4, 32], strides = [1, 1]} : vector<4x128xf32> to vector<4x32xf32>
    %145 = arith.mulf %142, %103 : vector<4x32xf32>
    %146 = arith.mulf %141, %144 : vector<4x32xf32>
    %147 = arith.addf %145, %146 : vector<4x32xf32>
    %148 = math.tanh %147 : vector<4x32xf32>
    %149 = arith.mulf %143, %148 : vector<4x32xf32>
    %150 = arith.mulf %149, %15 : vector<4x32xf32>
    %cst_38 = arith.constant dense<0.000000e+00> : vector<4xf32>
    %151 = vector.multi_reduction <add>, %150, %cst_38 [1] : vector<4x32xf32> to vector<4xf32>
    %152 = vector.shape_cast %151 : vector<4xf32> to vector<4x1xf32>
    %153 = arith.addf %152, %17 : vector<4x1xf32>
    %c0_39 = arith.constant 0 : index
    %c1 = arith.constant 1 : index
    %154 = vector.load %arg10[%c0_39, %c1] : memref<4x12xf32, #tpu.memory_space<vmem>>, vector<4x1xf32>
    tpu.vector_store %arg10[%c0_39, %c1], %153 {strides = array<i32>} : memref<4x12xf32, #tpu.memory_space<vmem>>, vector<4x1xf32>,
    %cst_40 = arith.constant dense<0.000000e+00> : vector<4x128xf32>
    %155 = tpu.matmul %129, %2, %cst_40 {dimension_numbers = #tpu.dot_dimension_numbers<[1], [0], [0], [1], [0, 0, 1, 1], [], []>} : vector<4x32xf32>, vector<32x128xf32>, vector<4x128xf32> -> vector<4x128xf32>
    %156 = arith.addf %35, %155 : vector<4x128xf32>
    %cst_41 = arith.constant 5.000000e-01 : f32
    %157 = vector.broadcast %cst_41 : f32 to vector<4x128xf32>
    %158 = arith.mulf %157, %156 : vector<4x128xf32>
    %159 = math.tanh %158 : vector<4x128xf32>
    %cst_42 = arith.constant 5.000000e-01 : f32
    %160 = vector.broadcast %cst_42 : f32 to vector<4x128xf32>
    %161 = arith.mulf %160, %159 : vector<4x128xf32>
    %cst_43 = arith.constant 5.000000e-01 : f32
    %162 = vector.broadcast %cst_43 : f32 to vector<4x128xf32>
    %163 = arith.addf %161, %162 : vector<4x128xf32>
    %164 = math.tanh %156 : vector<4x128xf32>
    %165 = vector.extract_strided_slice %163 {offsets = [0, 0], sizes = [4, 32], strides = [1, 1]} : vector<4x128xf32> to vector<4x32xf32>
    %166 = vector.extract_strided_slice %163 {offsets = [0, 32], sizes = [4, 32], strides = [1, 1]} : vector<4x128xf32> to vector<4x32xf32>
    %167 = vector.extract_strided_slice %163 {offsets = [0, 64], sizes = [4, 32], strides = [1, 1]} : vector<4x128xf32> to vector<4x32xf32>
    %168 = vector.extract_strided_slice %164 {offsets = [0, 96], sizes = [4, 32], strides = [1, 1]} : vector<4x128xf32> to vector<4x32xf32>
    %169 = arith.mulf %166, %127 : vector<4x32xf32>
    %170 = arith.mulf %165, %168 : vector<4x32xf32>
    %171 = arith.addf %169, %170 : vector<4x32xf32>
    %172 = math.tanh %171 : vector<4x32xf32>
    %173 = arith.mulf %167, %172 : vector<4x32xf32>
    %174 = tpu.concatenate %173, %149 in 1 : vector<4x32xf32>, vector<4x32xf32> -> vector<4x64xf32>
    %cst_44 = arith.constant dense<0.000000e+00> : vector<4x128xf32>
    %175 = tpu.matmul %174, %4, %cst_44 {dimension_numbers = #tpu.dot_dimension_numbers<[1], [0], [0], [1], [0, 0, 1, 1], [], []>} : vector<4x64xf32>, vector<64x128xf32>, vector<4x128xf32> -> vector<4x128xf32>
    %176 = arith.addf %175, %11 : vector<4x128xf32>
    %cst_45 = arith.constant 5.000000e-01 : f32
    %177 = vector.broadcast %cst_45 : f32 to vector<4x128xf32>
    %178 = arith.mulf %177, %176 : vector<4x128xf32>
    %179 = math.tanh %178 : vector<4x128xf32>
    %cst_46 = arith.constant 5.000000e-01 : f32
    %180 = vector.broadcast %cst_46 : f32 to vector<4x128xf32>
    %181 = arith.mulf %180, %179 : vector<4x128xf32>
    %cst_47 = arith.constant 5.000000e-01 : f32
    %182 = vector.broadcast %cst_47 : f32 to vector<4x128xf32>
    %183 = arith.addf %181, %182 : vector<4x128xf32>
    %184 = math.tanh %176 : vector<4x128xf32>
    %185 = vector.extract_strided_slice %183 {offsets = [0, 0], sizes = [4, 32], strides = [1, 1]} : vector<4x128xf32> to vector<4x32xf32>
    %186 = vector.extract_strided_slice %183 {offsets = [0, 32], sizes = [4, 32], strides = [1, 1]} : vector<4x128xf32> to vector<4x32xf32>
    %187 = vector.extract_strided_slice %183 {offsets = [0, 64], sizes = [4, 32], strides = [1, 1]} : vector<4x128xf32> to vector<4x32xf32>
    %188 = vector.extract_strided_slice %184 {offsets = [0, 96], sizes = [4, 32], strides = [1, 1]} : vector<4x128xf32> to vector<4x32xf32>
    %189 = arith.mulf %186, %147 : vector<4x32xf32>
    %190 = arith.mulf %185, %188 : vector<4x32xf32>
    %191 = arith.addf %189, %190 : vector<4x32xf32>
    %192 = math.tanh %191 : vector<4x32xf32>
    %193 = arith.mulf %187, %192 : vector<4x32xf32>
    %194 = arith.mulf %193, %15 : vector<4x32xf32>
    %cst_48 = arith.constant dense<0.000000e+00> : vector<4xf32>
    %195 = vector.multi_reduction <add>, %194, %cst_48 [1] : vector<4x32xf32> to vector<4xf32>
    %196 = vector.shape_cast %195 : vector<4xf32> to vector<4x1xf32>
    %197 = arith.addf %196, %17 : vector<4x1xf32>
    %c0_49 = arith.constant 0 : index
    %c2 = arith.constant 2 : index
    %198 = vector.load %arg10[%c0_49, %c2] : memref<4x12xf32, #tpu.memory_space<vmem>>, vector<4x1xf32>
    tpu.vector_store %arg10[%c0_49, %c2], %197 {strides = array<i32>} : memref<4x12xf32, #tpu.memory_space<vmem>>, vector<4x1xf32>,
    %cst_50 = arith.constant dense<0.000000e+00> : vector<4x128xf32>
    %199 = tpu.matmul %173, %2, %cst_50 {dimension_numbers = #tpu.dot_dimension_numbers<[1], [0], [0], [1], [0, 0, 1, 1], [], []>} : vector<4x32xf32>, vector<32x128xf32>, vector<4x128xf32> -> vector<4x128xf32>
    %200 = arith.addf %41, %199 : vector<4x128xf32>
    %cst_51 = arith.constant 5.000000e-01 : f32
    %201 = vector.broadcast %cst_51 : f32 to vector<4x128xf32>
    %202 = arith.mulf %201, %200 : vector<4x128xf32>
    %203 = math.tanh %202 : vector<4x128xf32>
    %cst_52 = arith.constant 5.000000e-01 : f32
    %204 = vector.broadcast %cst_52 : f32 to vector<4x128xf32>
    %205 = arith.mulf %204, %203 : vector<4x128xf32>
    %cst_53 = arith.constant 5.000000e-01 : f32
    %206 = vector.broadcast %cst_53 : f32 to vector<4x128xf32>
    %207 = arith.addf %205, %206 : vector<4x128xf32>
    %208 = math.tanh %200 : vector<4x128xf32>
    %209 = vector.extract_strided_slice %207 {offsets = [0, 0], sizes = [4, 32], strides = [1, 1]} : vector<4x128xf32> to vector<4x32xf32>
    %210 = vector.extract_strided_slice %207 {offsets = [0, 32], sizes = [4, 32], strides = [1, 1]} : vector<4x128xf32> to vector<4x32xf32>
    %211 = vector.extract_strided_slice %207 {offsets = [0, 64], sizes = [4, 32], strides = [1, 1]} : vector<4x128xf32> to vector<4x32xf32>
    %212 = vector.extract_strided_slice %208 {offsets = [0, 96], sizes = [4, 32], strides = [1, 1]} : vector<4x128xf32> to vector<4x32xf32>
    %213 = arith.mulf %210, %171 : vector<4x32xf32>
    %214 = arith.mulf %209, %212 : vector<4x32xf32>
    %215 = arith.addf %213, %214 : vector<4x32xf32>
    %216 = math.tanh %215 : vector<4x32xf32>
    %217 = arith.mulf %211, %216 : vector<4x32xf32>
    %218 = tpu.concatenate %217, %193 in 1 : vector<4x32xf32>, vector<4x32xf32> -> vector<4x64xf32>
    %cst_54 = arith.constant dense<0.000000e+00> : vector<4x128xf32>
    %219 = tpu.matmul %218, %4, %cst_54 {dimension_numbers = #tpu.dot_dimension_numbers<[1], [0], [0], [1], [0, 0, 1, 1], [], []>} : vector<4x64xf32>, vector<64x128xf32>, vector<4x128xf32> -> vector<4x128xf32>
    %220 = arith.addf %219, %11 : vector<4x128xf32>
    %cst_55 = arith.constant 5.000000e-01 : f32
    %221 = vector.broadcast %cst_55 : f32 to vector<4x128xf32>
    %222 = arith.mulf %221, %220 : vector<4x128xf32>
    %223 = math.tanh %222 : vector<4x128xf32>
    %cst_56 = arith.constant 5.000000e-01 : f32
    %224 = vector.broadcast %cst_56 : f32 to vector<4x128xf32>
    %225 = arith.mulf %224, %223 : vector<4x128xf32>
    %cst_57 = arith.constant 5.000000e-01 : f32
    %226 = vector.broadcast %cst_57 : f32 to vector<4x128xf32>
    %227 = arith.addf %225, %226 : vector<4x128xf32>
    %228 = math.tanh %220 : vector<4x128xf32>
    %229 = vector.extract_strided_slice %227 {offsets = [0, 0], sizes = [4, 32], strides = [1, 1]} : vector<4x128xf32> to vector<4x32xf32>
    %230 = vector.extract_strided_slice %227 {offsets = [0, 32], sizes = [4, 32], strides = [1, 1]} : vector<4x128xf32> to vector<4x32xf32>
    %231 = vector.extract_strided_slice %227 {offsets = [0, 64], sizes = [4, 32], strides = [1, 1]} : vector<4x128xf32> to vector<4x32xf32>
    %232 = vector.extract_strided_slice %228 {offsets = [0, 96], sizes = [4, 32], strides = [1, 1]} : vector<4x128xf32> to vector<4x32xf32>
    %233 = arith.mulf %230, %191 : vector<4x32xf32>
    %234 = arith.mulf %229, %232 : vector<4x32xf32>
    %235 = arith.addf %233, %234 : vector<4x32xf32>
    %236 = math.tanh %235 : vector<4x32xf32>
    %237 = arith.mulf %231, %236 : vector<4x32xf32>
    %238 = arith.mulf %237, %15 : vector<4x32xf32>
    %cst_58 = arith.constant dense<0.000000e+00> : vector<4xf32>
    %239 = vector.multi_reduction <add>, %238, %cst_58 [1] : vector<4x32xf32> to vector<4xf32>
    %240 = vector.shape_cast %239 : vector<4xf32> to vector<4x1xf32>
    %241 = arith.addf %240, %17 : vector<4x1xf32>
    %c0_59 = arith.constant 0 : index
    %c3 = arith.constant 3 : index
    %242 = vector.load %arg10[%c0_59, %c3] : memref<4x12xf32, #tpu.memory_space<vmem>>, vector<4x1xf32>
    tpu.vector_store %arg10[%c0_59, %c3], %241 {strides = array<i32>} : memref<4x12xf32, #tpu.memory_space<vmem>>, vector<4x1xf32>,
    %cst_60 = arith.constant dense<0.000000e+00> : vector<4x128xf32>
    %243 = tpu.matmul %217, %2, %cst_60 {dimension_numbers = #tpu.dot_dimension_numbers<[1], [0], [0], [1], [0, 0, 1, 1], [], []>} : vector<4x32xf32>, vector<32x128xf32>, vector<4x128xf32> -> vector<4x128xf32>
    %244 = arith.addf %47, %243 : vector<4x128xf32>
    %cst_61 = arith.constant 5.000000e-01 : f32
    %245 = vector.broadcast %cst_61 : f32 to vector<4x128xf32>
    %246 = arith.mulf %245, %244 : vector<4x128xf32>
    %247 = math.tanh %246 : vector<4x128xf32>
    %cst_62 = arith.constant 5.000000e-01 : f32
    %248 = vector.broadcast %cst_62 : f32 to vector<4x128xf32>
    %249 = arith.mulf %248, %247 : vector<4x128xf32>
    %cst_63 = arith.constant 5.000000e-01 : f32
    %250 = vector.broadcast %cst_63 : f32 to vector<4x128xf32>
    %251 = arith.addf %249, %250 : vector<4x128xf32>
    %252 = math.tanh %244 : vector<4x128xf32>
    %253 = vector.extract_strided_slice %251 {offsets = [0, 0], sizes = [4, 32], strides = [1, 1]} : vector<4x128xf32> to vector<4x32xf32>
    %254 = vector.extract_strided_slice %251 {offsets = [0, 32], sizes = [4, 32], strides = [1, 1]} : vector<4x128xf32> to vector<4x32xf32>
    %255 = vector.extract_strided_slice %251 {offsets = [0, 64], sizes = [4, 32], strides = [1, 1]} : vector<4x128xf32> to vector<4x32xf32>
    %256 = vector.extract_strided_slice %252 {offsets = [0, 96], sizes = [4, 32], strides = [1, 1]} : vector<4x128xf32> to vector<4x32xf32>
    %257 = arith.mulf %254, %215 : vector<4x32xf32>
    %258 = arith.mulf %253, %256 : vector<4x32xf32>
    %259 = arith.addf %257, %258 : vector<4x32xf32>
    %260 = math.tanh %259 : vector<4x32xf32>
    %261 = arith.mulf %255, %260 : vector<4x32xf32>
    %262 = tpu.concatenate %261, %237 in 1 : vector<4x32xf32>, vector<4x32xf32> -> vector<4x64xf32>
    %cst_64 = arith.constant dense<0.000000e+00> : vector<4x128xf32>
    %263 = tpu.matmul %262, %4, %cst_64 {dimension_numbers = #tpu.dot_dimension_numbers<[1], [0], [0], [1], [0, 0, 1, 1], [], []>} : vector<4x64xf32>, vector<64x128xf32>, vector<4x128xf32> -> vector<4x128xf32>
    %264 = arith.addf %263, %11 : vector<4x128xf32>
    %cst_65 = arith.constant 5.000000e-01 : f32
    %265 = vector.broadcast %cst_65 : f32 to vector<4x128xf32>
    %266 = arith.mulf %265, %264 : vector<4x128xf32>
    %267 = math.tanh %266 : vector<4x128xf32>
    %cst_66 = arith.constant 5.000000e-01 : f32
    %268 = vector.broadcast %cst_66 : f32 to vector<4x128xf32>
    %269 = arith.mulf %268, %267 : vector<4x128xf32>
    %cst_67 = arith.constant 5.000000e-01 : f32
    %270 = vector.broadcast %cst_67 : f32 to vector<4x128xf32>
    %271 = arith.addf %269, %270 : vector<4x128xf32>
    %272 = math.tanh %264 : vector<4x128xf32>
    %273 = vector.extract_strided_slice %271 {offsets = [0, 0], sizes = [4, 32], strides = [1, 1]} : vector<4x128xf32> to vector<4x32xf32>
    %274 = vector.extract_strided_slice %271 {offsets = [0, 32], sizes = [4, 32], strides = [1, 1]} : vector<4x128xf32> to vector<4x32xf32>
    %275 = vector.extract_strided_slice %271 {offsets = [0, 64], sizes = [4, 32], strides = [1, 1]} : vector<4x128xf32> to vector<4x32xf32>
    %276 = vector.extract_strided_slice %272 {offsets = [0, 96], sizes = [4, 32], strides = [1, 1]} : vector<4x128xf32> to vector<4x32xf32>
    %277 = arith.mulf %274, %235 : vector<4x32xf32>
    %278 = arith.mulf %273, %276 : vector<4x32xf32>
    %279 = arith.addf %277, %278 : vector<4x32xf32>
    %280 = math.tanh %279 : vector<4x32xf32>
    %281 = arith.mulf %275, %280 : vector<4x32xf32>
    %282 = arith.mulf %281, %15 : vector<4x32xf32>
    %cst_68 = arith.constant dense<0.000000e+00> : vector<4xf32>
    %283 = vector.multi_reduction <add>, %282, %cst_68 [1] : vector<4x32xf32> to vector<4xf32>
    %284 = vector.shape_cast %283 : vector<4xf32> to vector<4x1xf32>
    %285 = arith.addf %284, %17 : vector<4x1xf32>
    %c0_69 = arith.constant 0 : index
    %c4 = arith.constant 4 : index
    %286 = vector.load %arg10[%c0_69, %c4] : memref<4x12xf32, #tpu.memory_space<vmem>>, vector<4x1xf32>
    tpu.vector_store %arg10[%c0_69, %c4], %285 {strides = array<i32>} : memref<4x12xf32, #tpu.memory_space<vmem>>, vector<4x1xf32>,
    %cst_70 = arith.constant dense<0.000000e+00> : vector<4x128xf32>
    %287 = tpu.matmul %261, %2, %cst_70 {dimension_numbers = #tpu.dot_dimension_numbers<[1], [0], [0], [1], [0, 0, 1, 1], [], []>} : vector<4x32xf32>, vector<32x128xf32>, vector<4x128xf32> -> vector<4x128xf32>
    %288 = arith.addf %53, %287 : vector<4x128xf32>
    %cst_71 = arith.constant 5.000000e-01 : f32
    %289 = vector.broadcast %cst_71 : f32 to vector<4x128xf32>
    %290 = arith.mulf %289, %288 : vector<4x128xf32>
    %291 = math.tanh %290 : vector<4x128xf32>
    %cst_72 = arith.constant 5.000000e-01 : f32
    %292 = vector.broadcast %cst_72 : f32 to vector<4x128xf32>
    %293 = arith.mulf %292, %291 : vector<4x128xf32>
    %cst_73 = arith.constant 5.000000e-01 : f32
    %294 = vector.broadcast %cst_73 : f32 to vector<4x128xf32>
    %295 = arith.addf %293, %294 : vector<4x128xf32>
    %296 = math.tanh %288 : vector<4x128xf32>
    %297 = vector.extract_strided_slice %295 {offsets = [0, 0], sizes = [4, 32], strides = [1, 1]} : vector<4x128xf32> to vector<4x32xf32>
    %298 = vector.extract_strided_slice %295 {offsets = [0, 32], sizes = [4, 32], strides = [1, 1]} : vector<4x128xf32> to vector<4x32xf32>
    %299 = vector.extract_strided_slice %295 {offsets = [0, 64], sizes = [4, 32], strides = [1, 1]} : vector<4x128xf32> to vector<4x32xf32>
    %300 = vector.extract_strided_slice %296 {offsets = [0, 96], sizes = [4, 32], strides = [1, 1]} : vector<4x128xf32> to vector<4x32xf32>
    %301 = arith.mulf %298, %259 : vector<4x32xf32>
    %302 = arith.mulf %297, %300 : vector<4x32xf32>
    %303 = arith.addf %301, %302 : vector<4x32xf32>
    %304 = math.tanh %303 : vector<4x32xf32>
    %305 = arith.mulf %299, %304 : vector<4x32xf32>
    %306 = tpu.concatenate %305, %281 in 1 : vector<4x32xf32>, vector<4x32xf32> -> vector<4x64xf32>
    %cst_74 = arith.constant dense<0.000000e+00> : vector<4x128xf32>
    %307 = tpu.matmul %306, %4, %cst_74 {dimension_numbers = #tpu.dot_dimension_numbers<[1], [0], [0], [1], [0, 0, 1, 1], [], []>} : vector<4x64xf32>, vector<64x128xf32>, vector<4x128xf32> -> vector<4x128xf32>
    %308 = arith.addf %307, %11 : vector<4x128xf32>
    %cst_75 = arith.constant 5.000000e-01 : f32
    %309 = vector.broadcast %cst_75 : f32 to vector<4x128xf32>
    %310 = arith.mulf %309, %308 : vector<4x128xf32>
    %311 = math.tanh %310 : vector<4x128xf32>
    %cst_76 = arith.constant 5.000000e-01 : f32
    %312 = vector.broadcast %cst_76 : f32 to vector<4x128xf32>
    %313 = arith.mulf %312, %311 : vector<4x128xf32>
    %cst_77 = arith.constant 5.000000e-01 : f32
    %314 = vector.broadcast %cst_77 : f32 to vector<4x128xf32>
    %315 = arith.addf %313, %314 : vector<4x128xf32>
    %316 = math.tanh %308 : vector<4x128xf32>
    %317 = vector.extract_strided_slice %315 {offsets = [0, 0], sizes = [4, 32], strides = [1, 1]} : vector<4x128xf32> to vector<4x32xf32>
    %318 = vector.extract_strided_slice %315 {offsets = [0, 32], sizes = [4, 32], strides = [1, 1]} : vector<4x128xf32> to vector<4x32xf32>
    %319 = vector.extract_strided_slice %315 {offsets = [0, 64], sizes = [4, 32], strides = [1, 1]} : vector<4x128xf32> to vector<4x32xf32>
    %320 = vector.extract_strided_slice %316 {offsets = [0, 96], sizes = [4, 32], strides = [1, 1]} : vector<4x128xf32> to vector<4x32xf32>
    %321 = arith.mulf %318, %279 : vector<4x32xf32>
    %322 = arith.mulf %317, %320 : vector<4x32xf32>
    %323 = arith.addf %321, %322 : vector<4x32xf32>
    %324 = math.tanh %323 : vector<4x32xf32>
    %325 = arith.mulf %319, %324 : vector<4x32xf32>
    %326 = arith.mulf %325, %15 : vector<4x32xf32>
    %cst_78 = arith.constant dense<0.000000e+00> : vector<4xf32>
    %327 = vector.multi_reduction <add>, %326, %cst_78 [1] : vector<4x32xf32> to vector<4xf32>
    %328 = vector.shape_cast %327 : vector<4xf32> to vector<4x1xf32>
    %329 = arith.addf %328, %17 : vector<4x1xf32>
    %c0_79 = arith.constant 0 : index
    %c5 = arith.constant 5 : index
    %330 = vector.load %arg10[%c0_79, %c5] : memref<4x12xf32, #tpu.memory_space<vmem>>, vector<4x1xf32>
    tpu.vector_store %arg10[%c0_79, %c5], %329 {strides = array<i32>} : memref<4x12xf32, #tpu.memory_space<vmem>>, vector<4x1xf32>,
    %cst_80 = arith.constant dense<0.000000e+00> : vector<4x128xf32>
    %331 = tpu.matmul %305, %2, %cst_80 {dimension_numbers = #tpu.dot_dimension_numbers<[1], [0], [0], [1], [0, 0, 1, 1], [], []>} : vector<4x32xf32>, vector<32x128xf32>, vector<4x128xf32> -> vector<4x128xf32>
    %332 = arith.addf %59, %331 : vector<4x128xf32>
    %cst_81 = arith.constant 5.000000e-01 : f32
    %333 = vector.broadcast %cst_81 : f32 to vector<4x128xf32>
    %334 = arith.mulf %333, %332 : vector<4x128xf32>
    %335 = math.tanh %334 : vector<4x128xf32>
    %cst_82 = arith.constant 5.000000e-01 : f32
    %336 = vector.broadcast %cst_82 : f32 to vector<4x128xf32>
    %337 = arith.mulf %336, %335 : vector<4x128xf32>
    %cst_83 = arith.constant 5.000000e-01 : f32
    %338 = vector.broadcast %cst_83 : f32 to vector<4x128xf32>
    %339 = arith.addf %337, %338 : vector<4x128xf32>
    %340 = math.tanh %332 : vector<4x128xf32>
    %341 = vector.extract_strided_slice %339 {offsets = [0, 0], sizes = [4, 32], strides = [1, 1]} : vector<4x128xf32> to vector<4x32xf32>
    %342 = vector.extract_strided_slice %339 {offsets = [0, 32], sizes = [4, 32], strides = [1, 1]} : vector<4x128xf32> to vector<4x32xf32>
    %343 = vector.extract_strided_slice %339 {offsets = [0, 64], sizes = [4, 32], strides = [1, 1]} : vector<4x128xf32> to vector<4x32xf32>
    %344 = vector.extract_strided_slice %340 {offsets = [0, 96], sizes = [4, 32], strides = [1, 1]} : vector<4x128xf32> to vector<4x32xf32>
    %345 = arith.mulf %342, %303 : vector<4x32xf32>
    %346 = arith.mulf %341, %344 : vector<4x32xf32>
    %347 = arith.addf %345, %346 : vector<4x32xf32>
    %348 = math.tanh %347 : vector<4x32xf32>
    %349 = arith.mulf %343, %348 : vector<4x32xf32>
    %350 = tpu.concatenate %349, %325 in 1 : vector<4x32xf32>, vector<4x32xf32> -> vector<4x64xf32>
    %cst_84 = arith.constant dense<0.000000e+00> : vector<4x128xf32>
    %351 = tpu.matmul %350, %4, %cst_84 {dimension_numbers = #tpu.dot_dimension_numbers<[1], [0], [0], [1], [0, 0, 1, 1], [], []>} : vector<4x64xf32>, vector<64x128xf32>, vector<4x128xf32> -> vector<4x128xf32>
    %352 = arith.addf %351, %11 : vector<4x128xf32>
    %cst_85 = arith.constant 5.000000e-01 : f32
    %353 = vector.broadcast %cst_85 : f32 to vector<4x128xf32>
    %354 = arith.mulf %353, %352 : vector<4x128xf32>
    %355 = math.tanh %354 : vector<4x128xf32>
    %cst_86 = arith.constant 5.000000e-01 : f32
    %356 = vector.broadcast %cst_86 : f32 to vector<4x128xf32>
    %357 = arith.mulf %356, %355 : vector<4x128xf32>
    %cst_87 = arith.constant 5.000000e-01 : f32
    %358 = vector.broadcast %cst_87 : f32 to vector<4x128xf32>
    %359 = arith.addf %357, %358 : vector<4x128xf32>
    %360 = math.tanh %352 : vector<4x128xf32>
    %361 = vector.extract_strided_slice %359 {offsets = [0, 0], sizes = [4, 32], strides = [1, 1]} : vector<4x128xf32> to vector<4x32xf32>
    %362 = vector.extract_strided_slice %359 {offsets = [0, 32], sizes = [4, 32], strides = [1, 1]} : vector<4x128xf32> to vector<4x32xf32>
    %363 = vector.extract_strided_slice %359 {offsets = [0, 64], sizes = [4, 32], strides = [1, 1]} : vector<4x128xf32> to vector<4x32xf32>
    %364 = vector.extract_strided_slice %360 {offsets = [0, 96], sizes = [4, 32], strides = [1, 1]} : vector<4x128xf32> to vector<4x32xf32>
    %365 = arith.mulf %362, %323 : vector<4x32xf32>
    %366 = arith.mulf %361, %364 : vector<4x32xf32>
    %367 = arith.addf %365, %366 : vector<4x32xf32>
    %368 = math.tanh %367 : vector<4x32xf32>
    %369 = arith.mulf %363, %368 : vector<4x32xf32>
    %370 = arith.mulf %369, %15 : vector<4x32xf32>
    %cst_88 = arith.constant dense<0.000000e+00> : vector<4xf32>
    %371 = vector.multi_reduction <add>, %370, %cst_88 [1] : vector<4x32xf32> to vector<4xf32>
    %372 = vector.shape_cast %371 : vector<4xf32> to vector<4x1xf32>
    %373 = arith.addf %372, %17 : vector<4x1xf32>
    %c0_89 = arith.constant 0 : index
    %c6 = arith.constant 6 : index
    %374 = vector.load %arg10[%c0_89, %c6] : memref<4x12xf32, #tpu.memory_space<vmem>>, vector<4x1xf32>
    tpu.vector_store %arg10[%c0_89, %c6], %373 {strides = array<i32>} : memref<4x12xf32, #tpu.memory_space<vmem>>, vector<4x1xf32>,
    %cst_90 = arith.constant dense<0.000000e+00> : vector<4x128xf32>
    %375 = tpu.matmul %349, %2, %cst_90 {dimension_numbers = #tpu.dot_dimension_numbers<[1], [0], [0], [1], [0, 0, 1, 1], [], []>} : vector<4x32xf32>, vector<32x128xf32>, vector<4x128xf32> -> vector<4x128xf32>
    %376 = arith.addf %65, %375 : vector<4x128xf32>
    %cst_91 = arith.constant 5.000000e-01 : f32
    %377 = vector.broadcast %cst_91 : f32 to vector<4x128xf32>
    %378 = arith.mulf %377, %376 : vector<4x128xf32>
    %379 = math.tanh %378 : vector<4x128xf32>
    %cst_92 = arith.constant 5.000000e-01 : f32
    %380 = vector.broadcast %cst_92 : f32 to vector<4x128xf32>
    %381 = arith.mulf %380, %379 : vector<4x128xf32>
    %cst_93 = arith.constant 5.000000e-01 : f32
    %382 = vector.broadcast %cst_93 : f32 to vector<4x128xf32>
    %383 = arith.addf %381, %382 : vector<4x128xf32>
    %384 = math.tanh %376 : vector<4x128xf32>
    %385 = vector.extract_strided_slice %383 {offsets = [0, 0], sizes = [4, 32], strides = [1, 1]} : vector<4x128xf32> to vector<4x32xf32>
    %386 = vector.extract_strided_slice %383 {offsets = [0, 32], sizes = [4, 32], strides = [1, 1]} : vector<4x128xf32> to vector<4x32xf32>
    %387 = vector.extract_strided_slice %383 {offsets = [0, 64], sizes = [4, 32], strides = [1, 1]} : vector<4x128xf32> to vector<4x32xf32>
    %388 = vector.extract_strided_slice %384 {offsets = [0, 96], sizes = [4, 32], strides = [1, 1]} : vector<4x128xf32> to vector<4x32xf32>
    %389 = arith.mulf %386, %347 : vector<4x32xf32>
    %390 = arith.mulf %385, %388 : vector<4x32xf32>
    %391 = arith.addf %389, %390 : vector<4x32xf32>
    %392 = math.tanh %391 : vector<4x32xf32>
    %393 = arith.mulf %387, %392 : vector<4x32xf32>
    %394 = tpu.concatenate %393, %369 in 1 : vector<4x32xf32>, vector<4x32xf32> -> vector<4x64xf32>
    %cst_94 = arith.constant dense<0.000000e+00> : vector<4x128xf32>
    %395 = tpu.matmul %394, %4, %cst_94 {dimension_numbers = #tpu.dot_dimension_numbers<[1], [0], [0], [1], [0, 0, 1, 1], [], []>} : vector<4x64xf32>, vector<64x128xf32>, vector<4x128xf32> -> vector<4x128xf32>
    %396 = arith.addf %395, %11 : vector<4x128xf32>
    %cst_95 = arith.constant 5.000000e-01 : f32
    %397 = vector.broadcast %cst_95 : f32 to vector<4x128xf32>
    %398 = arith.mulf %397, %396 : vector<4x128xf32>
    %399 = math.tanh %398 : vector<4x128xf32>
    %cst_96 = arith.constant 5.000000e-01 : f32
    %400 = vector.broadcast %cst_96 : f32 to vector<4x128xf32>
    %401 = arith.mulf %400, %399 : vector<4x128xf32>
    %cst_97 = arith.constant 5.000000e-01 : f32
    %402 = vector.broadcast %cst_97 : f32 to vector<4x128xf32>
    %403 = arith.addf %401, %402 : vector<4x128xf32>
    %404 = math.tanh %396 : vector<4x128xf32>
    %405 = vector.extract_strided_slice %403 {offsets = [0, 0], sizes = [4, 32], strides = [1, 1]} : vector<4x128xf32> to vector<4x32xf32>
    %406 = vector.extract_strided_slice %403 {offsets = [0, 32], sizes = [4, 32], strides = [1, 1]} : vector<4x128xf32> to vector<4x32xf32>
    %407 = vector.extract_strided_slice %403 {offsets = [0, 64], sizes = [4, 32], strides = [1, 1]} : vector<4x128xf32> to vector<4x32xf32>
    %408 = vector.extract_strided_slice %404 {offsets = [0, 96], sizes = [4, 32], strides = [1, 1]} : vector<4x128xf32> to vector<4x32xf32>
    %409 = arith.mulf %406, %367 : vector<4x32xf32>
    %410 = arith.mulf %405, %408 : vector<4x32xf32>
    %411 = arith.addf %409, %410 : vector<4x32xf32>
    %412 = math.tanh %411 : vector<4x32xf32>
    %413 = arith.mulf %407, %412 : vector<4x32xf32>
    %414 = arith.mulf %413, %15 : vector<4x32xf32>
    %cst_98 = arith.constant dense<0.000000e+00> : vector<4xf32>
    %415 = vector.multi_reduction <add>, %414, %cst_98 [1] : vector<4x32xf32> to vector<4xf32>
    %416 = vector.shape_cast %415 : vector<4xf32> to vector<4x1xf32>
    %417 = arith.addf %416, %17 : vector<4x1xf32>
    %c0_99 = arith.constant 0 : index
    %c7 = arith.constant 7 : index
    %418 = vector.load %arg10[%c0_99, %c7] : memref<4x12xf32, #tpu.memory_space<vmem>>, vector<4x1xf32>
    tpu.vector_store %arg10[%c0_99, %c7], %417 {strides = array<i32>} : memref<4x12xf32, #tpu.memory_space<vmem>>, vector<4x1xf32>,
    %419 = tpu.concatenate %393, %413 in 1 : vector<4x32xf32>, vector<4x32xf32> -> vector<4x64xf32>
    %cst_100 = arith.constant dense<0.000000e+00> : vector<4x128xf32>
    %420 = tpu.matmul %419, %6, %cst_100 {dimension_numbers = #tpu.dot_dimension_numbers<[1], [0], [0], [1], [0, 0, 1, 1], [], []>} : vector<4x64xf32>, vector<64x128xf32>, vector<4x128xf32> -> vector<4x128xf32>
    %421 = arith.addf %420, %13 : vector<4x128xf32>
    %cst_101 = arith.constant 5.000000e-01 : f32
    %422 = vector.broadcast %cst_101 : f32 to vector<4x128xf32>
    %423 = arith.mulf %422, %421 : vector<4x128xf32>
    %424 = math.tanh %423 : vector<4x128xf32>
    %cst_102 = arith.constant 5.000000e-01 : f32
    %425 = vector.broadcast %cst_102 : f32 to vector<4x128xf32>
    %426 = arith.mulf %425, %424 : vector<4x128xf32>
    %cst_103 = arith.constant 5.000000e-01 : f32
    %427 = vector.broadcast %cst_103 : f32 to vector<4x128xf32>
    %428 = arith.addf %426, %427 : vector<4x128xf32>
    %429 = math.tanh %421 : vector<4x128xf32>
    %430 = vector.extract_strided_slice %428 {offsets = [0, 0], sizes = [4, 32], strides = [1, 1]} : vector<4x128xf32> to vector<4x32xf32>
    %431 = vector.extract_strided_slice %428 {offsets = [0, 32], sizes = [4, 32], strides = [1, 1]} : vector<4x128xf32> to vector<4x32xf32>
    %432 = vector.extract_strided_slice %428 {offsets = [0, 64], sizes = [4, 32], strides = [1, 1]} : vector<4x128xf32> to vector<4x32xf32>
    %433 = vector.extract_strided_slice %429 {offsets = [0, 96], sizes = [4, 32], strides = [1, 1]} : vector<4x128xf32> to vector<4x32xf32>
    %434 = arith.mulf %431, %391 : vector<4x32xf32>
    %435 = arith.mulf %430, %433 : vector<4x32xf32>
    %436 = arith.addf %434, %435 : vector<4x32xf32>
    %437 = math.tanh %436 : vector<4x32xf32>
    %438 = arith.mulf %432, %437 : vector<4x32xf32>
    %439 = tpu.concatenate %438, %413 in 1 : vector<4x32xf32>, vector<4x32xf32> -> vector<4x64xf32>
    %cst_104 = arith.constant dense<0.000000e+00> : vector<4x128xf32>
    %440 = tpu.matmul %439, %4, %cst_104 {dimension_numbers = #tpu.dot_dimension_numbers<[1], [0], [0], [1], [0, 0, 1, 1], [], []>} : vector<4x64xf32>, vector<64x128xf32>, vector<4x128xf32> -> vector<4x128xf32>
    %441 = arith.addf %440, %11 : vector<4x128xf32>
    %cst_105 = arith.constant 5.000000e-01 : f32
    %442 = vector.broadcast %cst_105 : f32 to vector<4x128xf32>
    %443 = arith.mulf %442, %441 : vector<4x128xf32>
    %444 = math.tanh %443 : vector<4x128xf32>
    %cst_106 = arith.constant 5.000000e-01 : f32
    %445 = vector.broadcast %cst_106 : f32 to vector<4x128xf32>
    %446 = arith.mulf %445, %444 : vector<4x128xf32>
    %cst_107 = arith.constant 5.000000e-01 : f32
    %447 = vector.broadcast %cst_107 : f32 to vector<4x128xf32>
    %448 = arith.addf %446, %447 : vector<4x128xf32>
    %449 = math.tanh %441 : vector<4x128xf32>
    %450 = vector.extract_strided_slice %448 {offsets = [0, 0], sizes = [4, 32], strides = [1, 1]} : vector<4x128xf32> to vector<4x32xf32>
    %451 = vector.extract_strided_slice %448 {offsets = [0, 32], sizes = [4, 32], strides = [1, 1]} : vector<4x128xf32> to vector<4x32xf32>
    %452 = vector.extract_strided_slice %448 {offsets = [0, 64], sizes = [4, 32], strides = [1, 1]} : vector<4x128xf32> to vector<4x32xf32>
    %453 = vector.extract_strided_slice %449 {offsets = [0, 96], sizes = [4, 32], strides = [1, 1]} : vector<4x128xf32> to vector<4x32xf32>
    %454 = arith.mulf %451, %411 : vector<4x32xf32>
    %455 = arith.mulf %450, %453 : vector<4x32xf32>
    %456 = arith.addf %454, %455 : vector<4x32xf32>
    %457 = math.tanh %456 : vector<4x32xf32>
    %458 = arith.mulf %452, %457 : vector<4x32xf32>
    %459 = arith.mulf %458, %15 : vector<4x32xf32>
    %cst_108 = arith.constant dense<0.000000e+00> : vector<4xf32>
    %460 = vector.multi_reduction <add>, %459, %cst_108 [1] : vector<4x32xf32> to vector<4xf32>
    %461 = vector.shape_cast %460 : vector<4xf32> to vector<4x1xf32>
    %462 = arith.addf %461, %17 : vector<4x1xf32>
    %c0_109 = arith.constant 0 : index
    %c8 = arith.constant 8 : index
    %463 = vector.load %arg10[%c0_109, %c8] : memref<4x12xf32, #tpu.memory_space<vmem>>, vector<4x1xf32>
    tpu.vector_store %arg10[%c0_109, %c8], %462 {strides = array<i32>} : memref<4x12xf32, #tpu.memory_space<vmem>>, vector<4x1xf32>,
    %464 = tpu.concatenate %438, %458 in 1 : vector<4x32xf32>, vector<4x32xf32> -> vector<4x64xf32>
    %cst_110 = arith.constant dense<0.000000e+00> : vector<4x128xf32>
    %465 = tpu.matmul %464, %6, %cst_110 {dimension_numbers = #tpu.dot_dimension_numbers<[1], [0], [0], [1], [0, 0, 1, 1], [], []>} : vector<4x64xf32>, vector<64x128xf32>, vector<4x128xf32> -> vector<4x128xf32>
    %466 = arith.addf %465, %13 : vector<4x128xf32>
    %cst_111 = arith.constant 5.000000e-01 : f32
    %467 = vector.broadcast %cst_111 : f32 to vector<4x128xf32>
    %468 = arith.mulf %467, %466 : vector<4x128xf32>
    %469 = math.tanh %468 : vector<4x128xf32>
    %cst_112 = arith.constant 5.000000e-01 : f32
    %470 = vector.broadcast %cst_112 : f32 to vector<4x128xf32>
    %471 = arith.mulf %470, %469 : vector<4x128xf32>
    %cst_113 = arith.constant 5.000000e-01 : f32
    %472 = vector.broadcast %cst_113 : f32 to vector<4x128xf32>
    %473 = arith.addf %471, %472 : vector<4x128xf32>
    %474 = math.tanh %466 : vector<4x128xf32>
    %475 = vector.extract_strided_slice %473 {offsets = [0, 0], sizes = [4, 32], strides = [1, 1]} : vector<4x128xf32> to vector<4x32xf32>
    %476 = vector.extract_strided_slice %473 {offsets = [0, 32], sizes = [4, 32], strides = [1, 1]} : vector<4x128xf32> to vector<4x32xf32>
    %477 = vector.extract_strided_slice %473 {offsets = [0, 64], sizes = [4, 32], strides = [1, 1]} : vector<4x128xf32> to vector<4x32xf32>
    %478 = vector.extract_strided_slice %474 {offsets = [0, 96], sizes = [4, 32], strides = [1, 1]} : vector<4x128xf32> to vector<4x32xf32>
    %479 = arith.mulf %476, %436 : vector<4x32xf32>
    %480 = arith.mulf %475, %478 : vector<4x32xf32>
    %481 = arith.addf %479, %480 : vector<4x32xf32>
    %482 = math.tanh %481 : vector<4x32xf32>
    %483 = arith.mulf %477, %482 : vector<4x32xf32>
    %484 = tpu.concatenate %483, %458 in 1 : vector<4x32xf32>, vector<4x32xf32> -> vector<4x64xf32>
    %cst_114 = arith.constant dense<0.000000e+00> : vector<4x128xf32>
    %485 = tpu.matmul %484, %4, %cst_114 {dimension_numbers = #tpu.dot_dimension_numbers<[1], [0], [0], [1], [0, 0, 1, 1], [], []>} : vector<4x64xf32>, vector<64x128xf32>, vector<4x128xf32> -> vector<4x128xf32>
    %486 = arith.addf %485, %11 : vector<4x128xf32>
    %cst_115 = arith.constant 5.000000e-01 : f32
    %487 = vector.broadcast %cst_115 : f32 to vector<4x128xf32>
    %488 = arith.mulf %487, %486 : vector<4x128xf32>
    %489 = math.tanh %488 : vector<4x128xf32>
    %cst_116 = arith.constant 5.000000e-01 : f32
    %490 = vector.broadcast %cst_116 : f32 to vector<4x128xf32>
    %491 = arith.mulf %490, %489 : vector<4x128xf32>
    %cst_117 = arith.constant 5.000000e-01 : f32
    %492 = vector.broadcast %cst_117 : f32 to vector<4x128xf32>
    %493 = arith.addf %491, %492 : vector<4x128xf32>
    %494 = math.tanh %486 : vector<4x128xf32>
    %495 = vector.extract_strided_slice %493 {offsets = [0, 0], sizes = [4, 32], strides = [1, 1]} : vector<4x128xf32> to vector<4x32xf32>
    %496 = vector.extract_strided_slice %493 {offsets = [0, 32], sizes = [4, 32], strides = [1, 1]} : vector<4x128xf32> to vector<4x32xf32>
    %497 = vector.extract_strided_slice %493 {offsets = [0, 64], sizes = [4, 32], strides = [1, 1]} : vector<4x128xf32> to vector<4x32xf32>
    %498 = vector.extract_strided_slice %494 {offsets = [0, 96], sizes = [4, 32], strides = [1, 1]} : vector<4x128xf32> to vector<4x32xf32>
    %499 = arith.mulf %496, %456 : vector<4x32xf32>
    %500 = arith.mulf %495, %498 : vector<4x32xf32>
    %501 = arith.addf %499, %500 : vector<4x32xf32>
    %502 = math.tanh %501 : vector<4x32xf32>
    %503 = arith.mulf %497, %502 : vector<4x32xf32>
    %504 = arith.mulf %503, %15 : vector<4x32xf32>
    %cst_118 = arith.constant dense<0.000000e+00> : vector<4xf32>
    %505 = vector.multi_reduction <add>, %504, %cst_118 [1] : vector<4x32xf32> to vector<4xf32>
    %506 = vector.shape_cast %505 : vector<4xf32> to vector<4x1xf32>
    %507 = arith.addf %506, %17 : vector<4x1xf32>
    %c0_119 = arith.constant 0 : index
    %c9 = arith.constant 9 : index
    %508 = vector.load %arg10[%c0_119, %c9] : memref<4x12xf32, #tpu.memory_space<vmem>>, vector<4x1xf32>
    tpu.vector_store %arg10[%c0_119, %c9], %507 {strides = array<i32>} : memref<4x12xf32, #tpu.memory_space<vmem>>, vector<4x1xf32>,
    %509 = tpu.concatenate %483, %503 in 1 : vector<4x32xf32>, vector<4x32xf32> -> vector<4x64xf32>
    %cst_120 = arith.constant dense<0.000000e+00> : vector<4x128xf32>
    %510 = tpu.matmul %509, %6, %cst_120 {dimension_numbers = #tpu.dot_dimension_numbers<[1], [0], [0], [1], [0, 0, 1, 1], [], []>} : vector<4x64xf32>, vector<64x128xf32>, vector<4x128xf32> -> vector<4x128xf32>
    %511 = arith.addf %510, %13 : vector<4x128xf32>
    %cst_121 = arith.constant 5.000000e-01 : f32
    %512 = vector.broadcast %cst_121 : f32 to vector<4x128xf32>
    %513 = arith.mulf %512, %511 : vector<4x128xf32>
    %514 = math.tanh %513 : vector<4x128xf32>
    %cst_122 = arith.constant 5.000000e-01 : f32
    %515 = vector.broadcast %cst_122 : f32 to vector<4x128xf32>
    %516 = arith.mulf %515, %514 : vector<4x128xf32>
    %cst_123 = arith.constant 5.000000e-01 : f32
    %517 = vector.broadcast %cst_123 : f32 to vector<4x128xf32>
    %518 = arith.addf %516, %517 : vector<4x128xf32>
    %519 = math.tanh %511 : vector<4x128xf32>
    %520 = vector.extract_strided_slice %518 {offsets = [0, 0], sizes = [4, 32], strides = [1, 1]} : vector<4x128xf32> to vector<4x32xf32>
    %521 = vector.extract_strided_slice %518 {offsets = [0, 32], sizes = [4, 32], strides = [1, 1]} : vector<4x128xf32> to vector<4x32xf32>
    %522 = vector.extract_strided_slice %518 {offsets = [0, 64], sizes = [4, 32], strides = [1, 1]} : vector<4x128xf32> to vector<4x32xf32>
    %523 = vector.extract_strided_slice %519 {offsets = [0, 96], sizes = [4, 32], strides = [1, 1]} : vector<4x128xf32> to vector<4x32xf32>
    %524 = arith.mulf %521, %481 : vector<4x32xf32>
    %525 = arith.mulf %520, %523 : vector<4x32xf32>
    %526 = arith.addf %524, %525 : vector<4x32xf32>
    %527 = math.tanh %526 : vector<4x32xf32>
    %528 = arith.mulf %522, %527 : vector<4x32xf32>
    %529 = tpu.concatenate %528, %503 in 1 : vector<4x32xf32>, vector<4x32xf32> -> vector<4x64xf32>
    %cst_124 = arith.constant dense<0.000000e+00> : vector<4x128xf32>
    %530 = tpu.matmul %529, %4, %cst_124 {dimension_numbers = #tpu.dot_dimension_numbers<[1], [0], [0], [1], [0, 0, 1, 1], [], []>} : vector<4x64xf32>, vector<64x128xf32>, vector<4x128xf32> -> vector<4x128xf32>
    %531 = arith.addf %530, %11 : vector<4x128xf32>
    %cst_125 = arith.constant 5.000000e-01 : f32
    %532 = vector.broadcast %cst_125 : f32 to vector<4x128xf32>
    %533 = arith.mulf %532, %531 : vector<4x128xf32>
    %534 = math.tanh %533 : vector<4x128xf32>
    %cst_126 = arith.constant 5.000000e-01 : f32
    %535 = vector.broadcast %cst_126 : f32 to vector<4x128xf32>
    %536 = arith.mulf %535, %534 : vector<4x128xf32>
    %cst_127 = arith.constant 5.000000e-01 : f32
    %537 = vector.broadcast %cst_127 : f32 to vector<4x128xf32>
    %538 = arith.addf %536, %537 : vector<4x128xf32>
    %539 = math.tanh %531 : vector<4x128xf32>
    %540 = vector.extract_strided_slice %538 {offsets = [0, 0], sizes = [4, 32], strides = [1, 1]} : vector<4x128xf32> to vector<4x32xf32>
    %541 = vector.extract_strided_slice %538 {offsets = [0, 32], sizes = [4, 32], strides = [1, 1]} : vector<4x128xf32> to vector<4x32xf32>
    %542 = vector.extract_strided_slice %538 {offsets = [0, 64], sizes = [4, 32], strides = [1, 1]} : vector<4x128xf32> to vector<4x32xf32>
    %543 = vector.extract_strided_slice %539 {offsets = [0, 96], sizes = [4, 32], strides = [1, 1]} : vector<4x128xf32> to vector<4x32xf32>
    %544 = arith.mulf %541, %501 : vector<4x32xf32>
    %545 = arith.mulf %540, %543 : vector<4x32xf32>
    %546 = arith.addf %544, %545 : vector<4x32xf32>
    %547 = math.tanh %546 : vector<4x32xf32>
    %548 = arith.mulf %542, %547 : vector<4x32xf32>
    %549 = arith.mulf %548, %15 : vector<4x32xf32>
    %cst_128 = arith.constant dense<0.000000e+00> : vector<4xf32>
    %550 = vector.multi_reduction <add>, %549, %cst_128 [1] : vector<4x32xf32> to vector<4xf32>
    %551 = vector.shape_cast %550 : vector<4xf32> to vector<4x1xf32>
    %552 = arith.addf %551, %17 : vector<4x1xf32>
    %c0_129 = arith.constant 0 : index
    %c10 = arith.constant 10 : index
    %553 = vector.load %arg10[%c0_129, %c10] : memref<4x12xf32, #tpu.memory_space<vmem>>, vector<4x1xf32>
    tpu.vector_store %arg10[%c0_129, %c10], %552 {strides = array<i32>} : memref<4x12xf32, #tpu.memory_space<vmem>>, vector<4x1xf32>,
    %554 = tpu.concatenate %528, %548 in 1 : vector<4x32xf32>, vector<4x32xf32> -> vector<4x64xf32>
    %cst_130 = arith.constant dense<0.000000e+00> : vector<4x128xf32>
    %555 = tpu.matmul %554, %6, %cst_130 {dimension_numbers = #tpu.dot_dimension_numbers<[1], [0], [0], [1], [0, 0, 1, 1], [], []>} : vector<4x64xf32>, vector<64x128xf32>, vector<4x128xf32> -> vector<4x128xf32>
    %556 = arith.addf %555, %13 : vector<4x128xf32>
    %cst_131 = arith.constant 5.000000e-01 : f32
    %557 = vector.broadcast %cst_131 : f32 to vector<4x128xf32>
    %558 = arith.mulf %557, %556 : vector<4x128xf32>
    %559 = math.tanh %558 : vector<4x128xf32>
    %cst_132 = arith.constant 5.000000e-01 : f32
    %560 = vector.broadcast %cst_132 : f32 to vector<4x128xf32>
    %561 = arith.mulf %560, %559 : vector<4x128xf32>
    %cst_133 = arith.constant 5.000000e-01 : f32
    %562 = vector.broadcast %cst_133 : f32 to vector<4x128xf32>
    %563 = arith.addf %561, %562 : vector<4x128xf32>
    %564 = math.tanh %556 : vector<4x128xf32>
    %565 = vector.extract_strided_slice %563 {offsets = [0, 0], sizes = [4, 32], strides = [1, 1]} : vector<4x128xf32> to vector<4x32xf32>
    %566 = vector.extract_strided_slice %563 {offsets = [0, 32], sizes = [4, 32], strides = [1, 1]} : vector<4x128xf32> to vector<4x32xf32>
    %567 = vector.extract_strided_slice %563 {offsets = [0, 64], sizes = [4, 32], strides = [1, 1]} : vector<4x128xf32> to vector<4x32xf32>
    %568 = vector.extract_strided_slice %564 {offsets = [0, 96], sizes = [4, 32], strides = [1, 1]} : vector<4x128xf32> to vector<4x32xf32>
    %569 = arith.mulf %566, %526 : vector<4x32xf32>
    %570 = arith.mulf %565, %568 : vector<4x32xf32>
    %571 = arith.addf %569, %570 : vector<4x32xf32>
    %572 = math.tanh %571 : vector<4x32xf32>
    %573 = arith.mulf %567, %572 : vector<4x32xf32>
    %574 = tpu.concatenate %573, %548 in 1 : vector<4x32xf32>, vector<4x32xf32> -> vector<4x64xf32>
    %cst_134 = arith.constant dense<0.000000e+00> : vector<4x128xf32>
    %575 = tpu.matmul %574, %4, %cst_134 {dimension_numbers = #tpu.dot_dimension_numbers<[1], [0], [0], [1], [0, 0, 1, 1], [], []>} : vector<4x64xf32>, vector<64x128xf32>, vector<4x128xf32> -> vector<4x128xf32>
    %576 = arith.addf %575, %11 : vector<4x128xf32>
    %cst_135 = arith.constant 5.000000e-01 : f32
    %577 = vector.broadcast %cst_135 : f32 to vector<4x128xf32>
    %578 = arith.mulf %577, %576 : vector<4x128xf32>
    %579 = math.tanh %578 : vector<4x128xf32>
    %cst_136 = arith.constant 5.000000e-01 : f32
    %580 = vector.broadcast %cst_136 : f32 to vector<4x128xf32>
    %581 = arith.mulf %580, %579 : vector<4x128xf32>
    %cst_137 = arith.constant 5.000000e-01 : f32
    %582 = vector.broadcast %cst_137 : f32 to vector<4x128xf32>
    %583 = arith.addf %581, %582 : vector<4x128xf32>
    %584 = math.tanh %576 : vector<4x128xf32>
    %585 = vector.extract_strided_slice %583 {offsets = [0, 0], sizes = [4, 32], strides = [1, 1]} : vector<4x128xf32> to vector<4x32xf32>
    %586 = vector.extract_strided_slice %583 {offsets = [0, 32], sizes = [4, 32], strides = [1, 1]} : vector<4x128xf32> to vector<4x32xf32>
    %587 = vector.extract_strided_slice %583 {offsets = [0, 64], sizes = [4, 32], strides = [1, 1]} : vector<4x128xf32> to vector<4x32xf32>
    %588 = vector.extract_strided_slice %584 {offsets = [0, 96], sizes = [4, 32], strides = [1, 1]} : vector<4x128xf32> to vector<4x32xf32>
    %589 = arith.mulf %586, %546 : vector<4x32xf32>
    %590 = arith.mulf %585, %588 : vector<4x32xf32>
    %591 = arith.addf %589, %590 : vector<4x32xf32>
    %592 = math.tanh %591 : vector<4x32xf32>
    %593 = arith.mulf %587, %592 : vector<4x32xf32>
    %594 = arith.mulf %593, %15 : vector<4x32xf32>
    %cst_138 = arith.constant dense<0.000000e+00> : vector<4xf32>
    %595 = vector.multi_reduction <add>, %594, %cst_138 [1] : vector<4x32xf32> to vector<4xf32>
    %596 = vector.shape_cast %595 : vector<4xf32> to vector<4x1xf32>
    %597 = arith.addf %596, %17 : vector<4x1xf32>
    %c0_139 = arith.constant 0 : index
    %c11 = arith.constant 11 : index
    %598 = vector.load %arg10[%c0_139, %c11] : memref<4x12xf32, #tpu.memory_space<vmem>>, vector<4x1xf32>
    tpu.vector_store %arg10[%c0_139, %c11], %597 {strides = array<i32>} : memref<4x12xf32, #tpu.memory_space<vmem>>, vector<4x1xf32>,
    return
  }
}

</mosaic_0001>

<bundles_post_ra>
// kernel: sine_rnn_forward.1
= control target key start
LH: loop header
LB: loop body
LE: loop exit
PB: predicated region body
PF: predicated region fallthrough
CT: control target
= control target key end

     0   :  { %s4551_s0 = inlined_call_operand.vmem [shape: f32[4,8], index: 0, kind: input, shape index: {}]   ;;  %s4552_s1 = inlined_call_operand.vmem [shape: f32[1,128], index: 1, kind: input, shape index: {}]   ;;  %s4553_s2 = inlined_call_operand.vmem [shape: f32[32,128], index: 2, kind: input, shape index: {}]   ;;  %s4554_s3 = inlined_call_operand.vmem [shape: f32[1,128], index: 3, kind: input, shape index: {}]   ;;  %s4555_s4 = inlined_call_operand.vmem [shape: f32[64,128], index: 4, kind: input, shape index: {}]   ;;  %s4556_s5 = inlined_call_operand.vmem [shape: f32[1,128], index: 5, kind: input, shape index: {}]   ;;  %s4557_s6 = inlined_call_operand.vmem [shape: f32[64,128], index: 6, kind: input, shape index: {}]   ;;  %s4558_s7 = inlined_call_operand.vmem [shape: f32[1,128], index: 7, kind: input, shape index: {}]   ;;  %s4559_s8 = inlined_call_operand.vmem [shape: f32[1,32], index: 8, kind: input, shape index: {}]   ;;  %s4560_s9 = inlined_call_operand.<no memory space> [shape: f32[1,1], index: 9, kind: input, shape index: {}]   ;;  %s4561_s10 = inlined_call_operand.hbm [shape: f32[4,12], index: 10, kind: output, shape index: {}]  }
   0x1   :  { %v15_v0 = vstv %s4560_s9 }
   0x2   :  { %16 = vst [vmem:[#allocation2] sm:$0x1] %v15_v0 }
   0x3   :  { %v40_v1 = vld [vmem:[%s4553_s2] sm:$0xff]  ;;  %v41_v2 = vld [vmem:[%s4553_s2 + $0x8] sm:$0xff]  ;;  %v42_v3 = vld [vmem:[%s4553_s2 + $0x10] sm:$0xff]  ;;  %v3782_v4 = vmov 0.0|0.0   ;;  %vm3783_vm0 = vmmov 0   ;;  %v3784_v7 = vmov 0.0  }
   0x4   :  { %3339 = vmatprep.subr.bf16.mxu1 %v3782_v4  ;;  %v3876_v5 = vpack.c.bf16 %v41_v2, %v40_v1  ;;  %v43_v6 = vld [vmem:[%s4553_s2 + $0x18] sm:$0xff]  ;;  %2955 = vmatprep.mubr.msk.f32.mxu1 %vm3783_vm0, %v3784_v7  ;;  %v3886_v8 = vld [vmem:[%s4551_s0] sm:$0xf]  ;;  %v3785_v9 = vmov 0  }
   0x5   :  { %3605 = vset.pattern.permute.xlu0 %v3785_v9  ;;  %3357 = vmatprep.subr.bf16.mxu0 %v3782_v4 }
   0x6   :  { %17 = vsyncpa [#allocation4], 0  ;;  %3341 = vmatpush3.bf16.msra.mxu1 %v3876_v5  ;;  %v3890_v10 = vpack.c.bf16 %v43_v6, %v42_v3  ;;  %90 = vperm.xlu0 %3605, %v3886_v8   ;;  %v3908_v11 = vld [vmem:[%s4552_s1] ss:$0 sm:$0xff]  ;;  %s3786_s26 = smov 32   ;;  %v46_v30 = vld [vmem:[%s4555_s4 + $0x8] sm:$0xff] }
   0x7   :  { %3342 = vmatprep.subr.bf16.mxu1 %v3782_v4  ;;  %3359 = vmatpush3.bf16.msra.mxu0 %v3876_v5  ;;  %v3914_v14 = vld [vmem:[%s4554_s3] ss:$0 sm:$0xff]  ;;  %v47_v31 = vld [vmem:[%s4555_s4 + $0x10] sm:$0xff]  ;;  %v48_v33 = vld [vmem:[%s4555_s4 + $0x18] sm:$0xff]  ;;  %v3787_v42 = vmov 1   ;;  %vm149_vm1 = vcmask 261120  }
   0x8   :  { %3360 = vmatprep.subr.bf16.mxu0 %v3782_v4  ;;  %2985 = vmatprep.mubr.msk.f32.mxu0 %vm3783_vm0, %v3784_v7  ;;  %v45_v29 = vld [vmem:[%s4555_s4] sm:$0xff]  ;;  %v3937_v34 = vpack.c.bf16 %v48_v33, %v47_v31  ;;  %v50_v36 = vld [vmem:[%s4555_s4 + $0x28] sm:$0xff]  ;;  %v51_v38 = vld [vmem:[%s4555_s4 + $0x30] sm:$0xff]  ;;  %vm251_vm2 = vcmask 523264   ;;  %s3790_s22 = smov 96   ;;  %vm355_vm3 = vcmask 257024  }
   0x9   :  { %v3931_v32 = vpack.c.bf16 %v46_v30, %v45_v29  ;;  %v49_v35 = vld [vmem:[%s4555_s4 + $0x20] sm:$0xff]  ;;  %v52_v39 = vld [vmem:[%s4555_s4 + $0x38] sm:$0xff]  ;;  %3606 = vset.pattern.permute.xlu1 %v3787_v42  ;;  %s3788_s4 = smov 64   ;;  %vm360_vm4 = vcmask 3072   ;;  %vm574_vm5 = vcmask 11272   ;;  %s3797_s19 = smov 2  }
   0xa   :  { %3344 = vmatpush3.bf16.msra.mxu1 %v3890_v10  ;;  %v3947_v37 = vpack.c.bf16 %v50_v36, %v49_v35  ;;  %v3958_v41 = vpack.c.bf16 %v52_v39, %v51_v38  ;;  %v3989_v50 = vld [vmem:[%s4556_s5] ss:$0 sm:$0xff]  ;;  %vm788_vm6 = vcmask 19472   ;;  %s3799_s20 = smov 4   ;;  %vm1002_vm7 = vcmask 27672   ;;  %s3800_s21 = smov 5  }
   0xb   :  { %3345 = vmatprep.subr.bf16.mxu1 %v3782_v4  ;;  %3362 = vmatpush3.bf16.msra.mxu0 %v3890_v10  ;;  %vm1216_vm8 = vcmask 35872   ;;  %vm1430_vm9 = vcmask 44072   ;;  %s3802_s9 = smov 8   ;;  %vm1644_vm10 = vcmask 52272   ;;  %s3804_s23 = smov 9   ;;  %vm1858_vm11 = vcmask 60472  }
   0xc   :  { %3363 = vmatprep.subr.bf16.mxu0 %v3782_v4  ;;  %s3805_s0 = smov 11   ;;  %s3806_s2 = smov 10   ;;  %vm2073_vm12 = vcmask 68672   ;;  %vm2288_vm13 = vcmask 76872   ;;  %vm2503_vm14 = vcmask 85072   ;;  %vm2718_vm15 = vcmask 93272  }
   0xd   :  { %2956 = vmatmul.mubr.f32.vlgmr.msra.gmra.mrb[0].mxu1 %v3784_v7  ;;  %s3807_s24 = smov [#allocation3]  }
   0xe   :  { %2974 = vmatprep.mubr.msk.f32.mxu1 %vm3783_vm0, %v3784_v7  ;;  %3347 = vmatpush3.bf16.msra.mxu1 %v3931_v32  ;;  %s2726_s25 = sshll.u32 %s3807_s24, 4  ;;  %s2727_s25 = int_to_ptr.vmem [resolvable:$true] %s2726_s25 }
   0xf   :  { %3348 = vmatprep.subr.bf16.mxu1 %v3782_v4  ;;  %s3758_s1 = scalar_lea.vmem %s2727_s25, 64  ;;  %p3763_p1 = scmp.lt.s32.totalorder %s2727_s25, %s2727_s25 }
  0x10   :  { %p3759_p0 = scmp.ne.s32.totalorder %s2727_s25, %s3758_s1  ;;  %p3764_p2 = scmp.lt.s32.totalorder %s3758_s1, %s3758_s1 }
  0x12   :  { %3350 = vmatpush3.bf16.msra.mxu1 %v3937_v34  ;;  %p3765_p3 = por %p3764_p2, %p3763_p1 }
  0x13   :  { %3351 = vmatprep.subr.bf16.mxu1 %v3782_v4 }
  0x14   :  { %p3766_p4 = pnand %p3765_p3, %p3759_p0 }
  0x16   :  { %3353 = vmatpush3.bf16.msra.mxu1 %v3947_v37 }
  0x17   :  { %3354 = vmatprep.subr.bf16.mxu1 %v3782_v4 }
  0x1a   :  { %3356 = vmatpush3.bf16.msra.mxu1 %v3958_v41 }
  0x1b   :  { %3375 = vmatprep.subr.bf16.mxu1 %v3782_v4 }
  0x85   :  { %v91_v12 = vpop.permute.xlu0 %90 }
  0x86   :  { %v99_v13 = vmul.f32 %v3908_v11, %v91_v12 }
  0x88   :  { %v106_v15 = vadd.f32 %v3914_v14, %v99_v13 }
  0xe0   :  { %v219_v16 = vpop.f32.mrb[0].mxu1 }
  0xe1   :  { %v223_v17 = vadd.f32 %v219_v16, %v106_v15  ;;  %v2957_v18 = vpop.f32.mrb[1].mxu1 }
  0xe3   :  { %3613 = vtanh.f32 %v223_v17  ;;  %v224_v20 = vmul.f32 0.5, %v223_v17 }
  0xe5   :  { %3615 = vtanh.f32 %v224_v20 }
  0xed   :  { %v3614_v19 = vpop.eup %3613 }
  0xee   :  { %231 = vrot.lane.b32.xlu0 %v3614_v19, %s3786_s26 }
  0xef   :  { %v3616_v21 = vpop.eup %3615 }
  0xf0   :  { %v226_v22 = vmul.f32 0.5, %v3616_v21 }
  0xf2   :  { %v227_v23 = vadd.f32 0.5, %v226_v22  ;;  %v3789_v22 = vmov 2  }
  0xf3   :  { %3607 = vset.pattern.permute.xlu0 %v3789_v22 }
  0xf4   :  { %v229_v26 = vmul.f32 0.0, %v227_v23 }
 0x160   :  { %v232_v24 = vpop.permute.xlu0 %231 }
 0x161   :  { %v234_v25 = vmul.f32 %v232_v24, %v227_v23 }
 0x163   :  { %236 = vrot.lane.b32.xlu1 %v234_v25, %s3786_s26 }
 0x1d5   :  { %v237_v27 = vpop.permute.xlu1 %236 }
 0x1d6   :  { %v3919_v28 = vadd.f32 %v237_v27, %v229_v26 }
 0x1d8   :  { %3617 = vtanh.f32 %v3919_v28 }
 0x1e2   :  { %v3618_v40 = vpop.eup %3617 }
 0x1e3   :  { %242 = vrot.lane.b32.xlu1 %v3618_v40, %s3786_s26 }
 0x1e7   :  { %108 = vperm.xlu1 %3606, %v3886_v8  }
 0x255   :  { %v243_v43 = vpop.permute.xlu1 %242 }
 0x256   :  { %v245_v44 = vmul.f32 %v243_v43, %v227_v23 }
 0x258   :  { %247 = vrot.lane.b32.xlu0 %v245_v44, %s3788_s4 }
 0x266   :  { %v109_v47 = vpop.permute.xlu1 %108 }
 0x267   :  { %v111_v48 = vmul.f32 %v3908_v11, %v109_v47 }
 0x269   :  { %v112_v49 = vadd.f32 %v3914_v14, %v111_v48 }
 0x2ca   :  { %v248_v45 = vpop.permute.xlu0 %247 }
 0x2cb   :  { %v250_v46 = vsel %vm149_vm1, %v248_v45, 0.0  ;;  %2986 = vmatmul.mubr.msk.f32.vlgmr.msra.gmra.mrb[0].mxu0 %vm149_vm1, %v248_v45 }
 0x2cc   :  { %2975 = vmatmul.mubr.msk.f32.vlgmr.msra.gmra.mrb[2].mxu1 %vm251_vm2, %v250_v46  ;;  %3365 = vmatpush3.bf16.msra.mxu0 %v3931_v32 }
 0x2cd   :  { %3366 = vmatprep.subr.bf16.mxu0 %v3782_v4  ;;  %3377 = vmatpush3.bf16.msra.mxu1 %v3876_v5 }
 0x2ce   :  { %3378 = vmatprep.subr.bf16.mxu1 %v3782_v4  ;;  %3015 = vmatprep.mubr.msk.f32.mxu1 %vm3783_vm0, %v3784_v7 }
 0x2cf   :  { %3004 = vmatprep.mubr.msk.f32.mxu0 %vm3783_vm0, %v3784_v7 }
 0x2d0   :  { %3368 = vmatpush3.bf16.msra.mxu0 %v3937_v34 }
 0x2d1   :  { %3369 = vmatprep.subr.bf16.mxu0 %v3782_v4  ;;  %3380 = vmatpush3.bf16.msra.mxu1 %v3890_v10 }
 0x2d2   :  { %3381 = vmatprep.subr.bf16.mxu1 %v3782_v4 }
 0x2d4   :  { %3371 = vmatpush3.bf16.msra.mxu0 %v3947_v37 }
 0x2d5   :  { %3372 = vmatprep.subr.bf16.mxu0 %v3782_v4 }
 0x2d8   :  { %3374 = vmatpush3.bf16.msra.mxu0 %v3958_v41 }
 0x2d9   :  { %3393 = vmatprep.subr.bf16.mxu0 %v3782_v4 }
 0x39e   :  { %v430_v51 = vpop.f32.mrb[0].mxu0 }
 0x39f   :  { %v434_v52 = vadd.f32 %v430_v51, %v112_v49  ;;  %v321_v53 = vpop.f32.mrb[2].mxu1  ;;  %v2987_v54 = vpop.f32.mrb[1].mxu0 }
 0x3a0   :  { %v322_v55 = vadd.f32 %v3989_v50, %v321_v53  ;;  %v2976_v56 = vpop.f32.mrb[3].mxu1 }
 0x3a1   :  { %3619 = vtanh.f32 %v434_v52  ;;  %v435_v59 = vmul.f32 0.5, %v434_v52 }
 0x3a2   :  { %3621 = vtanh.f32 %v322_v55  ;;  %v325_v60 = vmul.f32 0.5, %v322_v55 }
 0x3a3   :  { %3623 = vtanh.f32 %v435_v59 }
 0x3a4   :  { %3625 = vtanh.f32 %v325_v60 }
 0x3ab   :  { %v3620_v57 = vpop.eup %3619 }
 0x3ac   :  { %v3622_v58 = vpop.eup %3621  ;;  %442 = vrot.lane.b32.xlu1 %v3620_v57, %s3786_s26 }
 0x3ad   :  { %332 = vrot.lane.b32.xlu0 %v3622_v58, %s3786_s26  ;;  %v3624_v61 = vpop.eup %3623 }
 0x3ae   :  { %v3626_v62 = vpop.eup %3625  ;;  %v437_v63 = vmul.f32 0.5, %v3624_v61 }
 0x3af   :  { %v327_v0 = vmul.f32 0.5, %v3626_v62 }
 0x3b0   :  { %v438_v1 = vadd.f32 0.5, %v437_v63 }
 0x3b1   :  { %v328_v3 = vadd.f32 0.5, %v327_v0 }
 0x3b2   :  { %v440_v13 = vmul.f32 %v438_v1, %v3919_v28 }
 0x3b3   :  { %v330_v16 = vmul.f32 0.0, %v328_v3 }
 0x41e   :  { %v443_v2 = vpop.permute.xlu1 %442 }
 0x41f   :  { %v445_v6 = vmul.f32 %v443_v2, %v438_v1  ;;  %v333_v9 = vpop.permute.xlu0 %332  ;;  %v3791_v2 = vmov 3  }
 0x420   :  { %v335_v12 = vmul.f32 %v333_v9, %v328_v3 }
 0x421   :  { %447 = vrot.lane.b32.xlu1 %v445_v6, %s3786_s26 }
 0x422   :  { %337 = vrot.lane.b32.xlu0 %v335_v12, %s3786_s26 }
 0x493   :  { %v448_v15 = vpop.permute.xlu1 %447 }
 0x494   :  { %v3997_v17 = vadd.f32 %v448_v15, %v440_v13  ;;  %v338_v18 = vpop.permute.xlu0 %337 }
 0x495   :  { %v3999_v19 = vadd.f32 %v338_v18, %v330_v16 }
 0x496   :  { %3627 = vtanh.f32 %v3997_v17 }
 0x497   :  { %3629 = vtanh.f32 %v3999_v19 }
 0x4a0   :  { %v3628_v20 = vpop.eup %3627 }
 0x4a1   :  { %v3630_v21 = vpop.eup %3629  ;;  %453 = vrot.lane.b32.xlu1 %v3628_v20, %s3786_s26 }
 0x4a2   :  { %343 = vrot.lane.b32.xlu0 %v3630_v21, %s3786_s26 }
 0x513   :  { %v454_v23 = vpop.permute.xlu1 %453 }
 0x514   :  { %v456_v24 = vmul.f32 %v454_v23, %v438_v1  ;;  %v344_v25 = vpop.permute.xlu0 %343 }
 0x515   :  { %v4005_v26 = vmul.f32 %v344_v25, %v328_v3 }
 0x516   :  { %458 = vrot.lane.b32.xlu0 %v456_v24, %s3788_s4 }
 0x517   :  { %462 = vrot.lane.b32.xlu1 %v4005_v26, %s3790_s22 }
 0x51a   :  { %114 = vperm.xlu0 %3607, %v3886_v8  }
 0x51e   :  { %3608 = vset.pattern.permute.xlu0 %v3791_v2 }
 0x588   :  { %v459_v27 = vpop.permute.xlu0 %458 }
 0x589   :  { %3016 = vmatmul.mubr.msk.f32.vlgmr.msra.gmra.mrb[4].mxu1 %vm149_vm1, %v459_v27  ;;  %v463_v28 = vpop.permute.xlu1 %462 }
 0x58a   :  { %v465_v29 = vsel %vm149_vm1, %v459_v27, %v463_v28  ;;  %3383 = vmatpush3.bf16.msra.mxu1 %v3931_v32  ;;  %3034 = vmatprep.mubr.msk.f32.mxu1 %vm3783_vm0, %v3784_v7 }
 0x58b   :  { %3005 = vmatmul.mubr.msk.f32.vlgmr.msra.gmra.mrb[2].mxu0 %vm251_vm2, %v465_v29  ;;  %3384 = vmatprep.subr.bf16.mxu1 %v3782_v4 }
 0x58c   :  { %3395 = vmatpush3.bf16.msra.mxu0 %v3876_v5  ;;  %3045 = vmatprep.mubr.msk.f32.mxu0 %vm3783_vm0, %v3784_v7 }
 0x58d   :  { %3396 = vmatprep.subr.bf16.mxu0 %v3782_v4 }
 0x58e   :  { %3386 = vmatpush3.bf16.msra.mxu1 %v3937_v34 }
 0x58f   :  { %3387 = vmatprep.subr.bf16.mxu1 %v3782_v4 }
 0x590   :  { %3398 = vmatpush3.bf16.msra.mxu0 %v3890_v10 }
 0x591   :  { %3399 = vmatprep.subr.bf16.mxu0 %v3782_v4 }
 0x592   :  { %3389 = vmatpush3.bf16.msra.mxu1 %v3947_v37 }
 0x593   :  { %3390 = vmatprep.subr.bf16.mxu1 %v3782_v4 }
 0x596   :  { %3392 = vmatpush3.bf16.msra.mxu1 %v3958_v41 }
 0x597   :  { %3411 = vmatprep.subr.bf16.mxu1 %v3782_v4 }
 0x599   :  { %v115_v30 = vpop.permute.xlu0 %114 }
 0x59a   :  { %v117_v31 = vmul.f32 %v3908_v11, %v115_v30 }
 0x59c   :  { %v118_v36 = vadd.f32 %v3914_v14, %v117_v31 }
 0x65c   :  { %v644_v33 = vpop.f32.mrb[4].mxu1 }
 0x65d   :  { %v3017_v35 = vpop.f32.mrb[5].mxu1  ;;  %v648_v42 = vadd.f32 %v644_v33, %v118_v36 }
 0x65e   :  { %v535_v38 = vpop.f32.mrb[2].mxu0 }
 0x65f   :  { %v536_v39 = vadd.f32 %v3989_v50, %v535_v38  ;;  %v3006_v40 = vpop.f32.mrb[3].mxu0  ;;  %v649_v46 = vmul.f32 0.5, %v648_v42 }
 0x661   :  { %3631 = vtanh.f32 %v536_v39  ;;  %v539_v45 = vmul.f32 0.5, %v536_v39 }
 0x662   :  { %3633 = vtanh.f32 %v648_v42 }
 0x663   :  { %3635 = vtanh.f32 %v539_v45 }
 0x664   :  { %3637 = vtanh.f32 %v649_v46 }
 0x66b   :  { %v3632_v43 = vpop.eup %3631 }
 0x66c   :  { %546 = vrot.lane.b32.xlu1 %v3632_v43, %s3786_s26  ;;  %v3634_v44 = vpop.eup %3633 }
 0x66d   :  { %v3636_v47 = vpop.eup %3635 }
 0x66e   :  { %v541_v48 = vmul.f32 0.5, %v3636_v47  ;;  %v3638_v49 = vpop.eup %3637 }
 0x66f   :  { %v651_v51 = vmul.f32 0.5, %v3638_v49 }
 0x670   :  { %656 = vrot.lane.b32.xlu1 %v3634_v44, %s3786_s26  ;;  %v542_v52 = vadd.f32 0.5, %v541_v48 }
 0x671   :  { %v652_v55 = vadd.f32 0.5, %v651_v51 }
 0x672   :  { %v544_v58 = vmul.f32 %v542_v52, %v3999_v19 }
 0x673   :  { %v654_v61 = vmul.f32 %v652_v55, %v3997_v17 }
 0x6de   :  { %v547_v53 = vpop.permute.xlu1 %546 }
 0x6df   :  { %v549_v54 = vmul.f32 %v547_v53, %v542_v52 }
 0x6e1   :  { %551 = vrot.lane.b32.xlu0 %v549_v54, %s3786_s26  ;;  %v3792_v54 = vmov 4  }
 0x6e2   :  { %v657_v56 = vpop.permute.xlu1 %656 }
 0x6e3   :  { %v659_v57 = vmul.f32 %v657_v56, %v652_v55 }
 0x6e5   :  { %661 = vrot.lane.b32.xlu1 %v659_v57, %s3786_s26 }
 0x753   :  { %v552_v59 = vpop.permute.xlu0 %551 }
 0x754   :  { %v4038_v60 = vadd.f32 %v552_v59, %v544_v58 }
 0x756   :  { %3639 = vtanh.f32 %v4038_v60 }
 0x757   :  { %v662_v62 = vpop.permute.xlu1 %661 }
 0x758   :  { %v4042_v63 = vadd.f32 %v662_v62, %v654_v61 }
 0x75a   :  { %3641 = vtanh.f32 %v4042_v63 }
 0x760   :  { %v3640_v0 = vpop.eup %3639 }
 0x761   :  { %557 = vrot.lane.b32.xlu0 %v3640_v0, %s3786_s26 }
 0x764   :  { %v3642_v1 = vpop.eup %3641 }
 0x765   :  { %667 = vrot.lane.b32.xlu1 %v3642_v1, %s3786_s26 }
 0x7d3   :  { %v558_v3 = vpop.permute.xlu0 %557 }
 0x7d4   :  { %v4047_v6 = vmul.f32 %v558_v3, %v542_v52 }
 0x7d6   :  { %676 = vrot.lane.b32.xlu1 %v4047_v6, %s3790_s22 }
 0x7d7   :  { %v668_v9 = vpop.permute.xlu1 %667 }
 0x7d8   :  { %v670_v12 = vmul.f32 %v668_v9, %v652_v55 }
 0x7da   :  { %672 = vrot.lane.b32.xlu0 %v670_v12, %s3788_s4 }
 0x7de   :  { %120 = vperm.xlu0 %3608, %v3886_v8  }
 0x7e2   :  { %3609 = vset.pattern.permute.xlu0 %v3792_v54 }
 0x848   :  { %v677_v13 = vpop.permute.xlu1 %676 }
 0x84c   :  { %v673_v15 = vpop.permute.xlu0 %672 }
 0x84d   :  { %v679_v16 = vsel %vm149_vm1, %v673_v15, %v677_v13  ;;  %3046 = vmatmul.mubr.msk.f32.vlgmr.msra.gmra.mrb[4].mxu0 %vm149_vm1, %v673_v15 }
 0x84e   :  { %3035 = vmatmul.mubr.msk.f32.vlgmr.msra.gmra.mrb[6].mxu1 %vm251_vm2, %v679_v16  ;;  %3401 = vmatpush3.bf16.msra.mxu0 %v3931_v32 }
 0x84f   :  { %3402 = vmatprep.subr.bf16.mxu0 %v3782_v4  ;;  %3413 = vmatpush3.bf16.msra.mxu1 %v3876_v5 }
 0x850   :  { %3414 = vmatprep.subr.bf16.mxu1 %v3782_v4  ;;  %3075 = vmatprep.mubr.msk.f32.mxu1 %vm3783_vm0, %v3784_v7 }
 0x851   :  { %3064 = vmatprep.mubr.msk.f32.mxu0 %vm3783_vm0, %v3784_v7 }
 0x852   :  { %3404 = vmatpush3.bf16.msra.mxu0 %v3937_v34 }
 0x853   :  { %3405 = vmatprep.subr.bf16.mxu0 %v3782_v4  ;;  %3416 = vmatpush3.bf16.msra.mxu1 %v3890_v10 }
 0x854   :  { %3417 = vmatprep.subr.bf16.mxu1 %v3782_v4 }
 0x856   :  { %3407 = vmatpush3.bf16.msra.mxu0 %v3947_v37 }
 0x857   :  { %3408 = vmatprep.subr.bf16.mxu0 %v3782_v4 }
 0x85a   :  { %3410 = vmatpush3.bf16.msra.mxu0 %v3958_v41 }
 0x85b   :  { %3429 = vmatprep.subr.bf16.mxu0 %v3782_v4 }
 0x85d   :  { %v121_v17 = vpop.permute.xlu0 %120 }
 0x85e   :  { %v123_v18 = vmul.f32 %v3908_v11, %v121_v17 }
 0x860   :  { %v124_v19 = vadd.f32 %v3914_v14, %v123_v18 }
 0x920   :  { %v858_v20 = vpop.f32.mrb[4].mxu0 }
 0x921   :  { %v749_v21 = vpop.f32.mrb[6].mxu1  ;;  %v3047_v22 = vpop.f32.mrb[5].mxu0  ;;  %v862_v25 = vadd.f32 %v858_v20, %v124_v19 }
 0x922   :  { %v750_v23 = vadd.f32 %v3989_v50, %v749_v21  ;;  %v3036_v24 = vpop.f32.mrb[7].mxu1 }
 0x923   :  { %v863_v30 = vmul.f32 0.5, %v862_v25 }
 0x924   :  { %3643 = vtanh.f32 %v750_v23  ;;  %v753_v29 = vmul.f32 0.5, %v750_v23 }
 0x925   :  { %3645 = vtanh.f32 %v862_v25 }
 0x926   :  { %3647 = vtanh.f32 %v753_v29 }
 0x927   :  { %3649 = vtanh.f32 %v863_v30 }
 0x92e   :  { %v3644_v27 = vpop.eup %3643 }
 0x92f   :  { %760 = vrot.lane.b32.xlu1 %v3644_v27, %s3786_s26  ;;  %v3646_v28 = vpop.eup %3645 }
 0x930   :  { %v3648_v31 = vpop.eup %3647 }
 0x931   :  { %v755_v33 = vmul.f32 0.5, %v3648_v31  ;;  %v3650_v35 = vpop.eup %3649 }
 0x932   :  { %v865_v36 = vmul.f32 0.5, %v3650_v35 }
 0x933   :  { %870 = vrot.lane.b32.xlu1 %v3646_v28, %s3786_s26  ;;  %v756_v38 = vadd.f32 0.5, %v755_v33 }
 0x934   :  { %v866_v42 = vadd.f32 0.5, %v865_v36 }
 0x935   :  { %v758_v45 = vmul.f32 %v756_v38, %v4038_v60 }
 0x936   :  { %v868_v48 = vmul.f32 %v866_v42, %v4042_v63 }
 0x9a1   :  { %v761_v39 = vpop.permute.xlu1 %760 }
 0x9a2   :  { %v763_v40 = vmul.f32 %v761_v39, %v756_v38 }
 0x9a4   :  { %765 = vrot.lane.b32.xlu0 %v763_v40, %s3786_s26 }
 0x9a5   :  { %v871_v43 = vpop.permute.xlu1 %870 }
 0x9a6   :  { %v873_v44 = vmul.f32 %v871_v43, %v866_v42 }
 0x9a8   :  { %875 = vrot.lane.b32.xlu1 %v873_v44, %s3786_s26 }
 0xa16   :  { %v766_v46 = vpop.permute.xlu0 %765 }
 0xa17   :  { %v4080_v47 = vadd.f32 %v766_v46, %v758_v45 }
 0xa19   :  { %3651 = vtanh.f32 %v4080_v47 }
 0xa1a   :  { %v876_v49 = vpop.permute.xlu1 %875 }
 0xa1b   :  { %v4084_v51 = vadd.f32 %v876_v49, %v868_v48 }
 0xa1d   :  { %3653 = vtanh.f32 %v4084_v51 }
 0xa23   :  { %v3652_v52 = vpop.eup %3651 }
 0xa24   :  { %771 = vrot.lane.b32.xlu0 %v3652_v52, %s3786_s26 }
 0xa27   :  { %v3654_v53 = vpop.eup %3653 }
 0xa28   :  { %881 = vrot.lane.b32.xlu1 %v3654_v53, %s3786_s26 }
 0xa96   :  { %v772_v55 = vpop.permute.xlu0 %771 }
 0xa97   :  { %v4089_v56 = vmul.f32 %v772_v55, %v756_v38 }
 0xa99   :  { %890 = vrot.lane.b32.xlu1 %v4089_v56, %s3790_s22 }
 0xa9a   :  { %v882_v57 = vpop.permute.xlu1 %881 }
 0xa9b   :  { %v884_v58 = vmul.f32 %v882_v57, %v866_v42  ;;  %v3793_v42 = vmov 5  }
 0xa9d   :  { %886 = vrot.lane.b32.xlu0 %v884_v58, %s3788_s4 }
 0xaa1   :  { %126 = vperm.xlu0 %3609, %v3886_v8  }
 0xaa5   :  { %3610 = vset.pattern.permute.xlu0 %v3793_v42 }
 0xb0b   :  { %v891_v59 = vpop.permute.xlu1 %890 }
 0xb0f   :  { %v887_v60 = vpop.permute.xlu0 %886 }
 0xb10   :  { %v893_v61 = vsel %vm149_vm1, %v887_v60, %v891_v59  ;;  %3076 = vmatmul.mubr.msk.f32.vlgmr.msra.gmra.mrb[8].mxu1 %vm149_vm1, %v887_v60 }
 0xb11   :  { %3065 = vmatmul.mubr.msk.f32.vlgmr.msra.gmra.mrb[6].mxu0 %vm251_vm2, %v893_v61  ;;  %3419 = vmatpush3.bf16.msra.mxu1 %v3931_v32 }
 0xb12   :  { %3420 = vmatprep.subr.bf16.mxu1 %v3782_v4  ;;  %3431 = vmatpush3.bf16.msra.mxu0 %v3876_v5 }
 0xb13   :  { %3432 = vmatprep.subr.bf16.mxu0 %v3782_v4  ;;  %3105 = vmatprep.mubr.msk.f32.mxu0 %vm3783_vm0, %v3784_v7 }
 0xb14   :  { %3094 = vmatprep.mubr.msk.f32.mxu1 %vm3783_vm0, %v3784_v7 }
 0xb15   :  { %3422 = vmatpush3.bf16.msra.mxu1 %v3937_v34 }
 0xb16   :  { %3423 = vmatprep.subr.bf16.mxu1 %v3782_v4  ;;  %3434 = vmatpush3.bf16.msra.mxu0 %v3890_v10 }
 0xb17   :  { %3435 = vmatprep.subr.bf16.mxu0 %v3782_v4 }
 0xb19   :  { %3425 = vmatpush3.bf16.msra.mxu1 %v3947_v37 }
 0xb1a   :  { %3426 = vmatprep.subr.bf16.mxu1 %v3782_v4 }
 0xb1d   :  { %3428 = vmatpush3.bf16.msra.mxu1 %v3958_v41 }
 0xb1e   :  { %3447 = vmatprep.subr.bf16.mxu1 %v3782_v4 }
 0xb20   :  { %v127_v62 = vpop.permute.xlu0 %126 }
 0xb21   :  { %v129_v63 = vmul.f32 %v3908_v11, %v127_v62 }
 0xb23   :  { %v130_v0 = vadd.f32 %v3914_v14, %v129_v63 }
 0xbe3   :  { %v1072_v1 = vpop.f32.mrb[8].mxu1 }
 0xbe4   :  { %v963_v2 = vpop.f32.mrb[6].mxu0  ;;  %v3077_v3 = vpop.f32.mrb[9].mxu1  ;;  %v1076_v13 = vadd.f32 %v1072_v1, %v130_v0 }
 0xbe5   :  { %v964_v9 = vadd.f32 %v3989_v50, %v963_v2  ;;  %v3066_v12 = vpop.f32.mrb[7].mxu0 }
 0xbe6   :  { %v1077_v18 = vmul.f32 0.5, %v1076_v13 }
 0xbe7   :  { %3655 = vtanh.f32 %v964_v9  ;;  %v967_v17 = vmul.f32 0.5, %v964_v9 }
 0xbe8   :  { %3657 = vtanh.f32 %v1076_v13 }
 0xbe9   :  { %3659 = vtanh.f32 %v967_v17 }
 0xbea   :  { %3661 = vtanh.f32 %v1077_v18 }
 0xbf1   :  { %v3656_v15 = vpop.eup %3655 }
 0xbf2   :  { %974 = vrot.lane.b32.xlu1 %v3656_v15, %s3786_s26  ;;  %v3658_v16 = vpop.eup %3657 }
 0xbf3   :  { %v3660_v19 = vpop.eup %3659 }
 0xbf4   :  { %v969_v20 = vmul.f32 0.5, %v3660_v19  ;;  %v3662_v21 = vpop.eup %3661 }
 0xbf5   :  { %v1079_v22 = vmul.f32 0.5, %v3662_v21 }
 0xbf6   :  { %1084 = vrot.lane.b32.xlu1 %v3658_v16, %s3786_s26  ;;  %v970_v23 = vadd.f32 0.5, %v969_v20 }
 0xbf7   :  { %v1080_v27 = vadd.f32 0.5, %v1079_v22 }
 0xbf8   :  { %v972_v30 = vmul.f32 %v970_v23, %v4080_v47 }
 0xbf9   :  { %v1082_v35 = vmul.f32 %v1080_v27, %v4084_v51 }
 0xc64   :  { %v975_v24 = vpop.permute.xlu1 %974 }
 0xc65   :  { %v977_v25 = vmul.f32 %v975_v24, %v970_v23 }
 0xc67   :  { %979 = vrot.lane.b32.xlu0 %v977_v25, %s3786_s26 }
 0xc68   :  { %v1085_v28 = vpop.permute.xlu1 %1084 }
 0xc69   :  { %v1087_v29 = vmul.f32 %v1085_v28, %v1080_v27  ;;  %v3794_v28 = vmov 6  }
 0xc6b   :  { %1089 = vrot.lane.b32.xlu1 %v1087_v29, %s3786_s26 }
 0xcd9   :  { %v980_v31 = vpop.permute.xlu0 %979 }
 0xcda   :  { %v4122_v33 = vadd.f32 %v980_v31, %v972_v30 }
 0xcdc   :  { %3663 = vtanh.f32 %v4122_v33 }
 0xcdd   :  { %v1090_v36 = vpop.permute.xlu1 %1089 }
 0xcde   :  { %v4126_v38 = vadd.f32 %v1090_v36, %v1082_v35 }
 0xce0   :  { %3665 = vtanh.f32 %v4126_v38 }
 0xce6   :  { %v3664_v39 = vpop.eup %3663 }
 0xce7   :  { %985 = vrot.lane.b32.xlu0 %v3664_v39, %s3786_s26 }
 0xcea   :  { %v3666_v40 = vpop.eup %3665 }
 0xceb   :  { %1095 = vrot.lane.b32.xlu1 %v3666_v40, %s3786_s26 }
 0xd59   :  { %v986_v43 = vpop.permute.xlu0 %985 }
 0xd5a   :  { %v4131_v44 = vmul.f32 %v986_v43, %v970_v23 }
 0xd5c   :  { %1104 = vrot.lane.b32.xlu1 %v4131_v44, %s3790_s22 }
 0xd5d   :  { %v1096_v45 = vpop.permute.xlu1 %1095 }
 0xd5e   :  { %v1098_v46 = vmul.f32 %v1096_v45, %v1080_v27 }
 0xd60   :  { %1100 = vrot.lane.b32.xlu0 %v1098_v46, %s3788_s4 }
 0xd64   :  { %132 = vperm.xlu0 %3610, %v3886_v8  }
 0xd68   :  { %3611 = vset.pattern.permute.xlu0 %v3794_v28 }
 0xdce   :  { %v1105_v47 = vpop.permute.xlu1 %1104 }
 0xdd2   :  { %v1101_v48 = vpop.permute.xlu0 %1100 }
 0xdd3   :  { %v1107_v49 = vsel %vm149_vm1, %v1101_v48, %v1105_v47  ;;  %3106 = vmatmul.mubr.msk.f32.vlgmr.msra.gmra.mrb[8].mxu0 %vm149_vm1, %v1101_v48 }
 0xdd4   :  { %3095 = vmatmul.mubr.msk.f32.vlgmr.msra.gmra.mrb[10].mxu1 %vm251_vm2, %v1107_v49  ;;  %3437 = vmatpush3.bf16.msra.mxu0 %v3931_v32 }
 0xdd5   :  { %3438 = vmatprep.subr.bf16.mxu0 %v3782_v4  ;;  %3449 = vmatpush3.bf16.msra.mxu1 %v3876_v5 }
 0xdd6   :  { %3450 = vmatprep.subr.bf16.mxu1 %v3782_v4  ;;  %3135 = vmatprep.mubr.msk.f32.mxu1 %vm3783_vm0, %v3784_v7 }
 0xdd7   :  { %3124 = vmatprep.mubr.msk.f32.mxu0 %vm3783_vm0, %v3784_v7 }
 0xdd8   :  { %3440 = vmatpush3.bf16.msra.mxu0 %v3937_v34 }
 0xdd9   :  { %3441 = vmatprep.subr.bf16.mxu0 %v3782_v4  ;;  %3452 = vmatpush3.bf16.msra.mxu1 %v3890_v10 }
 0xdda   :  { %3453 = vmatprep.subr.bf16.mxu1 %v3782_v4 }
 0xddc   :  { %3443 = vmatpush3.bf16.msra.mxu0 %v3947_v37 }
 0xddd   :  { %3444 = vmatprep.subr.bf16.mxu0 %v3782_v4 }
 0xde0   :  { %3446 = vmatpush3.bf16.msra.mxu0 %v3958_v41 }
 0xde1   :  { %3465 = vmatprep.subr.bf16.mxu0 %v3782_v4 }
 0xde3   :  { %v133_v51 = vpop.permute.xlu0 %132 }
 0xde4   :  { %v135_v52 = vmul.f32 %v3908_v11, %v133_v51 }
 0xde6   :  { %v136_v53 = vadd.f32 %v3914_v14, %v135_v52 }
 0xea6   :  { %v1286_v54 = vpop.f32.mrb[8].mxu0 }
 0xea7   :  { %v1177_v55 = vpop.f32.mrb[10].mxu1  ;;  %v3107_v57 = vpop.f32.mrb[9].mxu0  ;;  %v1290_v60 = vadd.f32 %v1286_v54, %v136_v53 }
 0xea8   :  { %v1178_v58 = vadd.f32 %v3989_v50, %v1177_v55  ;;  %v3096_v59 = vpop.f32.mrb[11].mxu1 }
 0xea9   :  { %v1291_v0 = vmul.f32 0.5, %v1290_v60 }
 0xeaa   :  { %3667 = vtanh.f32 %v1178_v58  ;;  %v1181_v63 = vmul.f32 0.5, %v1178_v58 }
 0xeab   :  { %3669 = vtanh.f32 %v1290_v60 }
 0xeac   :  { %3671 = vtanh.f32 %v1181_v63 }
 0xead   :  { %3673 = vtanh.f32 %v1291_v0 }
 0xeb4   :  { %v3668_v61 = vpop.eup %3667 }
 0xeb5   :  { %1188 = vrot.lane.b32.xlu1 %v3668_v61, %s3786_s26  ;;  %v3670_v62 = vpop.eup %3669 }
 0xeb6   :  { %v3672_v1 = vpop.eup %3671 }
 0xeb7   :  { %v1183_v2 = vmul.f32 0.5, %v3672_v1  ;;  %v3674_v3 = vpop.eup %3673 }
 0xeb8   :  { %v1293_v12 = vmul.f32 0.5, %v3674_v3 }
 0xeb9   :  { %1298 = vrot.lane.b32.xlu1 %v3670_v62, %s3786_s26  ;;  %v1184_v9 = vadd.f32 0.5, %v1183_v2 }
 0xeba   :  { %v1294_v16 = vadd.f32 0.5, %v1293_v12 }
 0xebb   :  { %v1186_v19 = vmul.f32 %v1184_v9, %v4122_v33 }
 0xebc   :  { %v1296_v22 = vmul.f32 %v1294_v16, %v4126_v38 }
 0xf27   :  { %v1189_v13 = vpop.permute.xlu1 %1188 }
 0xf28   :  { %v1191_v15 = vmul.f32 %v1189_v13, %v1184_v9 }
 0xf2a   :  { %1193 = vrot.lane.b32.xlu0 %v1191_v15, %s3786_s26 }
 0xf2b   :  { %v1299_v17 = vpop.permute.xlu1 %1298 }
 0xf2c   :  { %v1301_v18 = vmul.f32 %v1299_v17, %v1294_v16 }
 0xf2e   :  { %1303 = vrot.lane.b32.xlu1 %v1301_v18, %s3786_s26 }
 0xf9c   :  { %v1194_v20 = vpop.permute.xlu0 %1193 }
 0xf9d   :  { %v4164_v21 = vadd.f32 %v1194_v20, %v1186_v19 }
 0xf9f   :  { %3675 = vtanh.f32 %v4164_v21 }
 0xfa0   :  { %v1304_v23 = vpop.permute.xlu1 %1303 }
 0xfa1   :  { %v4168_v24 = vadd.f32 %v1304_v23, %v1296_v22 }
 0xfa3   :  { %3677 = vtanh.f32 %v4168_v24 }
 0xfa9   :  { %v3676_v25 = vpop.eup %3675 }
 0xfaa   :  { %1199 = vrot.lane.b32.xlu0 %v3676_v25, %s3786_s26 }
 0xfad   :  { %v3678_v27 = vpop.eup %3677 }
 0xfae   :  { %1309 = vrot.lane.b32.xlu1 %v3678_v27, %s3786_s26 }
0x101c   :  { %v1200_v29 = vpop.permute.xlu0 %1199 }
0x101d   :  { %v4173_v30 = vmul.f32 %v1200_v29, %v1184_v9 }
0x101f   :  { %1318 = vrot.lane.b32.xlu1 %v4173_v30, %s3790_s22 }
0x1020   :  { %v1310_v31 = vpop.permute.xlu1 %1309 }
0x1021   :  { %v1312_v33 = vmul.f32 %v1310_v31, %v1294_v16  ;;  %v3795_v16 = vmov 7  }
0x1023   :  { %1314 = vrot.lane.b32.xlu0 %v1312_v33, %s3788_s4 }
0x1027   :  { %138 = vperm.xlu0 %3611, %v3886_v8  }
0x102b   :  { %3612 = vset.pattern.permute.xlu0 %v3795_v16 }
0x1091   :  { %v1319_v35 = vpop.permute.xlu1 %1318 }
0x1095   :  { %v1315_v36 = vpop.permute.xlu0 %1314 }
0x1096   :  { %v1321_v38 = vsel %vm149_vm1, %v1315_v36, %v1319_v35  ;;  %3136 = vmatmul.mubr.msk.f32.vlgmr.msra.gmra.mrb[12].mxu1 %vm149_vm1, %v1315_v36 }
0x1097   :  { %3125 = vmatmul.mubr.msk.f32.vlgmr.msra.gmra.mrb[10].mxu0 %vm251_vm2, %v1321_v38  ;;  %3455 = vmatpush3.bf16.msra.mxu1 %v3931_v32 }
0x1098   :  { %3456 = vmatprep.subr.bf16.mxu1 %v3782_v4  ;;  %3467 = vmatpush3.bf16.msra.mxu0 %v3876_v5 }
0x1099   :  { %3468 = vmatprep.subr.bf16.mxu0 %v3782_v4  ;;  %3165 = vmatprep.mubr.msk.f32.mxu0 %vm3783_vm0, %v3784_v7 }
0x109a   :  { %3154 = vmatprep.mubr.msk.f32.mxu1 %vm3783_vm0, %v3784_v7 }
0x109b   :  { %3458 = vmatpush3.bf16.msra.mxu1 %v3937_v34 }
0x109c   :  { %3459 = vmatprep.subr.bf16.mxu1 %v3782_v4  ;;  %3470 = vmatpush3.bf16.msra.mxu0 %v3890_v10 }
0x109d   :  { %3471 = vmatprep.subr.bf16.mxu0 %v3782_v4 }
0x109f   :  { %3461 = vmatpush3.bf16.msra.mxu1 %v3947_v37 }
0x10a0   :  { %3462 = vmatprep.subr.bf16.mxu1 %v3782_v4 }
0x10a3   :  { %3464 = vmatpush3.bf16.msra.mxu1 %v3958_v41 }
0x10a4   :  { %3483 = vmatprep.subr.bf16.mxu1 %v3782_v4 }
0x10a6   :  { %v139_v5 = vpop.permute.xlu0 %138 }
0x10a7   :  { %v141_v39 = vmul.f32 %v3908_v11, %v139_v5 }
0x10a9   :  { %v142_v40 = vadd.f32 %v3914_v14, %v141_v39 }
0x1169   :  { %v1500_v42 = vpop.f32.mrb[12].mxu1 }
0x116a   :  { %v1391_v43 = vpop.f32.mrb[10].mxu0  ;;  %v3137_v45 = vpop.f32.mrb[13].mxu1  ;;  %v1504_v47 = vadd.f32 %v1500_v42, %v142_v40 }
0x116b   :  { %v1392_v10 = vadd.f32 %v3989_v50, %v1391_v43  ;;  %v3126_v46 = vpop.f32.mrb[11].mxu0 }
0x116c   :  { %v1505_v52 = vmul.f32 0.5, %v1504_v47 }
0x116d   :  { %3679 = vtanh.f32 %v1392_v10  ;;  %v1395_v51 = vmul.f32 0.5, %v1392_v10 }
0x116e   :  { %3681 = vtanh.f32 %v1504_v47 }
0x116f   :  { %3683 = vtanh.f32 %v1395_v51 }
0x1170   :  { %3685 = vtanh.f32 %v1505_v52 }
0x1177   :  { %v3680_v48 = vpop.eup %3679 }
0x1178   :  { %1402 = vrot.lane.b32.xlu1 %v3680_v48, %s3786_s26  ;;  %v3682_v49 = vpop.eup %3681 }
0x1179   :  { %v3684_v53 = vpop.eup %3683 }
0x117a   :  { %v1397_v54 = vmul.f32 0.5, %v3684_v53  ;;  %v3686_v55 = vpop.eup %3685 }
0x117b   :  { %v1507_v58 = vmul.f32 0.5, %v3686_v55 }
0x117c   :  { %1512 = vrot.lane.b32.xlu1 %v3682_v49, %s3786_s26  ;;  %v1398_v57 = vadd.f32 0.5, %v1397_v54 }
0x117d   :  { %v1508_v61 = vadd.f32 0.5, %v1507_v58 }
0x117e   :  { %v1400_v0 = vmul.f32 %v1398_v57, %v4164_v21 }
0x117f   :  { %v1510_v3 = vmul.f32 %v1508_v61, %v4168_v24 }
0x11ea   :  { %v1403_v59 = vpop.permute.xlu1 %1402 }
0x11eb   :  { %v1405_v60 = vmul.f32 %v1403_v59, %v1398_v57 }
0x11ed   :  { %1407 = vrot.lane.b32.xlu0 %v1405_v60, %s3786_s26 }
0x11ee   :  { %v1513_v62 = vpop.permute.xlu1 %1512 }
0x11ef   :  { %v1515_v63 = vmul.f32 %v1513_v62, %v1508_v61 }
0x11f1   :  { %1517 = vrot.lane.b32.xlu1 %v1515_v63, %s3786_s26 }
0x125f   :  { %v1408_v1 = vpop.permute.xlu0 %1407 }
0x1260   :  { %v4206_v2 = vadd.f32 %v1408_v1, %v1400_v0 }
0x1262   :  { %3687 = vtanh.f32 %v4206_v2 }
0x1263   :  { %v1518_v9 = vpop.permute.xlu1 %1517 }
0x1264   :  { %v4210_v12 = vadd.f32 %v1518_v9, %v1510_v3 }
0x1266   :  { %3689 = vtanh.f32 %v4210_v12 }
0x126c   :  { %v3688_v13 = vpop.eup %3687 }
0x126d   :  { %1413 = vrot.lane.b32.xlu0 %v3688_v13, %s3786_s26 }
0x1270   :  { %v3690_v15 = vpop.eup %3689 }
0x1271   :  { %1523 = vrot.lane.b32.xlu1 %v3690_v15, %s3786_s26 }
0x12df   :  { %v1414_v17 = vpop.permute.xlu0 %1413 }
0x12e0   :  { %v4215_v18 = vmul.f32 %v1414_v17, %v1398_v57 }
0x12e2   :  { %1532 = vrot.lane.b32.xlu1 %v4215_v18, %s3790_s22 }
0x12e3   :  { %v1524_v19 = vpop.permute.xlu1 %1523 }
0x12e4   :  { %v1526_v20 = vmul.f32 %v1524_v19, %v1508_v61 }
0x12e6   :  { %1528 = vrot.lane.b32.xlu0 %v1526_v20, %s3788_s4 }
0x12ea   :  { %144 = vperm.xlu0 %3612, %v3886_v8  }
0x1354   :  { %v1533_v21 = vpop.permute.xlu1 %1532 }
0x1358   :  { %v1529_v22 = vpop.permute.xlu0 %1528 }
0x1359   :  { %v1535_v23 = vsel %vm149_vm1, %v1529_v22, %v1533_v21  ;;  %3166 = vmatmul.mubr.msk.f32.vlgmr.msra.gmra.mrb[12].mxu0 %vm149_vm1, %v1529_v22 }
0x135a   :  { %3155 = vmatmul.mubr.msk.f32.vlgmr.msra.gmra.mrb[14].mxu1 %vm251_vm2, %v1535_v23  ;;  %3473 = vmatpush3.bf16.msra.mxu0 %v3931_v32 }
0x135b   :  { %3474 = vmatprep.subr.bf16.mxu0 %v3782_v4  ;;  %3184 = vmatprep.mubr.msk.f32.mxu0 %vm3783_vm0, %v3784_v7 }
0x135c   :  { %3203 = vmatprep.mubr.msk.f32.mxu1 %vm3783_vm0, %v3784_v7 }
0x135e   :  { %3476 = vmatpush3.bf16.msra.mxu0 %v3937_v34 }
0x135f   :  { %3477 = vmatprep.subr.bf16.mxu0 %v3782_v4 }
0x1362   :  { %3479 = vmatpush3.bf16.msra.mxu0 %v3947_v37 }
0x1363   :  { %3480 = vmatprep.subr.bf16.mxu0 %v3782_v4 }
0x1366   :  { %3482 = vmatpush3.bf16.msra.mxu0 %v3958_v41 }
0x1367   :  { %3495 = vmatprep.subr.bf16.mxu0 %v3782_v4 }
0x1369   :  { %v145_v8 = vpop.permute.xlu0 %144 }
0x136a   :  { %v147_v24 = vmul.f32 %v3908_v11, %v145_v8  ;;  %v55_v8 = vld [vmem:[%s4557_s6 + $0x8] sm:$0xff] }
0x136c   :  { %v148_v25 = vadd.f32 %v3914_v14, %v147_v24  ;;  %v56_v24 = vld [vmem:[%s4557_s6 + $0x10] sm:$0xff] }
0x142c   :  { %v1714_v27 = vpop.f32.mrb[12].mxu0 }
0x142d   :  { %v1605_v28 = vpop.f32.mrb[14].mxu1  ;;  %v3167_v29 = vpop.f32.mrb[13].mxu0  ;;  %v1718_v35 = vadd.f32 %v1714_v27, %v148_v25  ;;  %v57_v27 = vld [vmem:[%s4557_s6 + $0x18] sm:$0xff] }
0x142e   :  { %v1606_v31 = vadd.f32 %v3989_v50, %v1605_v28  ;;  %v3156_v33 = vpop.f32.mrb[15].mxu1  ;;  %v4288_v28 = vpack.c.bf16 %v57_v27, %v56_v24  ;;  %v58_v29 = vld [vmem:[%s4557_s6 + $0x20] sm:$0xff] }
0x142f   :  { %v1719_v39 = vmul.f32 0.5, %v1718_v35 }
0x1430   :  { %3691 = vtanh.f32 %v1606_v31  ;;  %v1609_v5 = vmul.f32 0.5, %v1606_v31  ;;  %v59_v31 = vld [vmem:[%s4557_s6 + $0x28] sm:$0xff] }
0x1431   :  { %3693 = vtanh.f32 %v1718_v35  ;;  %v4298_v33 = vpack.c.bf16 %v59_v31, %v58_v29  ;;  %v60_v35 = vld [vmem:[%s4557_s6 + $0x30] sm:$0xff] }
0x1432   :  { %3695 = vtanh.f32 %v1609_v5 }
0x1433   :  { %3697 = vtanh.f32 %v1719_v39 }
0x143a   :  { %v3692_v36 = vpop.eup %3691 }
0x143b   :  { %1616 = vrot.lane.b32.xlu1 %v3692_v36, %s3786_s26  ;;  %v3694_v38 = vpop.eup %3693  ;;  %v61_v36 = vld [vmem:[%s4557_s6 + $0x38] sm:$0xff] }
0x143c   :  { %v3696_v11 = vpop.eup %3695  ;;  %v4309_v5 = vpack.c.bf16 %v61_v36, %v60_v35 }
0x143d   :  { %v1611_v14 = vmul.f32 0.5, %v3696_v11  ;;  %v3698_v40 = vpop.eup %3697 }
0x143e   :  { %v1721_v43 = vmul.f32 0.5, %v3698_v40 }
0x143f   :  { %1726 = vrot.lane.b32.xlu1 %v3694_v38, %s3786_s26  ;;  %v1612_v42 = vadd.f32 0.5, %v1611_v14 }
0x1440   :  { %v1722_v46 = vadd.f32 0.5, %v1721_v43 }
0x1441   :  { %v1614_v49 = vmul.f32 %v1612_v42, %v4206_v2 }
0x1442   :  { %v1724_v53 = vmul.f32 %v1722_v46, %v4210_v12 }
0x14ad   :  { %v1617_v45 = vpop.permute.xlu1 %1616 }
0x14ae   :  { %v1619_v10 = vmul.f32 %v1617_v45, %v1612_v42 }
0x14b0   :  { %1621 = vrot.lane.b32.xlu0 %v1619_v10, %s3786_s26 }
0x14b1   :  { %v1727_v47 = vpop.permute.xlu1 %1726 }
0x14b2   :  { %v1729_v48 = vmul.f32 %v1727_v47, %v1722_v46 }
0x14b4   :  { %1731 = vrot.lane.b32.xlu1 %v1729_v48, %s3786_s26 }
0x1522   :  { %v1622_v51 = vpop.permute.xlu0 %1621 }
0x1523   :  { %v1624_v52 = vadd.f32 %v1622_v51, %v1614_v49 }
0x1525   :  { %3699 = vtanh.f32 %v1624_v52 }
0x1526   :  { %v1732_v54 = vpop.permute.xlu1 %1731 }
0x1527   :  { %v4245_v55 = vadd.f32 %v1732_v54, %v1724_v53 }
0x1529   :  { %3701 = vtanh.f32 %v4245_v55 }
0x152f   :  { %v3700_v57 = vpop.eup %3699 }
0x1530   :  { %1627 = vrot.lane.b32.xlu0 %v3700_v57, %s3786_s26 }
0x1533   :  { %v3702_v58 = vpop.eup %3701 }
0x1534   :  { %1737 = vrot.lane.b32.xlu1 %v3702_v58, %s3786_s26 }
0x15a2   :  { %v1628_v59 = vpop.permute.xlu0 %1627 }
0x15a3   :  { %v4250_v60 = vmul.f32 %v1628_v59, %v1612_v42  ;;  %v4333_v42 = vld [vmem:[%s4558_s7] ss:$0 sm:$0xff] }
0x15a5   :  { %1746 = vrot.lane.b32.xlu1 %v4250_v60, %s3790_s22 }
0x15a6   :  { %v1738_v61 = vpop.permute.xlu1 %1737 }
0x15a7   :  { %v1740_v62 = vmul.f32 %v1738_v61, %v1722_v46 }
0x15a9   :  { %1742 = vrot.lane.b32.xlu0 %v1740_v62, %s3788_s4 }
0x1617   :  { %v1747_v63 = vpop.permute.xlu1 %1746 }
0x161b   :  { %v1743_v0 = vpop.permute.xlu0 %1742 }
0x161c   :  { %v1749_v1 = vsel %vm149_vm1, %v1743_v0, %v1747_v63 }
0x161d   :  { %3185 = vmatmul.mubr.msk.f32.vlgmr.msra.gmra.mrb[14].mxu0 %vm251_vm2, %v1749_v1  ;;  %v4359_v1 = vld [vmem:[%s4556_s5] ss:$0 sm:$0xff] }
0x161e   :  { %3497 = vmatpush3.bf16.msra.mxu0 %v3931_v32  ;;  %3222 = vmatprep.mubr.msk.f32.mxu0 %vm3783_vm0, %v3784_v7 }
0x161f   :  { %3498 = vmatprep.subr.bf16.mxu0 %v3782_v4 }
0x1622   :  { %3500 = vmatpush3.bf16.msra.mxu0 %v3937_v34 }
0x1623   :  { %3501 = vmatprep.subr.bf16.mxu0 %v3782_v4 }
0x1626   :  { %3503 = vmatpush3.bf16.msra.mxu0 %v3947_v37 }
0x1627   :  { %3504 = vmatprep.subr.bf16.mxu0 %v3782_v4 }
0x162a   :  { %3506 = vmatpush3.bf16.msra.mxu0 %v3958_v41 }
0x162b   :  { %3519 = vmatprep.subr.bf16.mxu0 %v3782_v4 }
0x16f0   :  { %v1819_v2 = vpop.f32.mrb[14].mxu0 }
0x16f1   :  { %v1820_v3 = vadd.f32 %v3989_v50, %v1819_v2  ;;  %v3186_v9 = vpop.f32.mrb[15].mxu0  ;;  %v54_v50 = vld [vmem:[%s4557_s6] sm:$0xff] }
0x16f2   :  { %v4282_v25 = vpack.c.bf16 %v55_v8, %v54_v50 }
0x16f3   :  { %3703 = vtanh.f32 %v1820_v3  ;;  %v1823_v13 = vmul.f32 0.5, %v1820_v3 }
0x16f4   :  { %3485 = vmatpush3.bf16.msra.mxu1 %v4282_v25 }
0x16f5   :  { %3705 = vtanh.f32 %v1823_v13  ;;  %3486 = vmatprep.subr.bf16.mxu1 %v3782_v4 }
0x16f8   :  { %3488 = vmatpush3.bf16.msra.mxu1 %v4288_v28 }
0x16f9   :  { %3489 = vmatprep.subr.bf16.mxu1 %v3782_v4 }
0x16fc   :  { %3491 = vmatpush3.bf16.msra.mxu1 %v4298_v33 }
0x16fd   :  { %v3704_v12 = vpop.eup %3703  ;;  %3492 = vmatprep.subr.bf16.mxu1 %v3782_v4 }
0x16fe   :  { %1830 = vrot.lane.b32.xlu0 %v3704_v12, %s3786_s26 }
0x16ff   :  { %v3706_v15 = vpop.eup %3705 }
0x1700   :  { %v1825_v16 = vmul.f32 0.5, %v3706_v15  ;;  %3494 = vmatpush3.bf16.msra.mxu1 %v4309_v5 }
0x1701   :  { %3507 = vmatprep.subr.bf16.mxu1 %v3782_v4 }
0x1702   :  { %v1826_v17 = vadd.f32 0.5, %v1825_v16 }
0x1704   :  { %v1828_v21 = vmul.f32 %v1826_v17, %v1624_v52 }
0x1770   :  { %v1831_v19 = vpop.permute.xlu0 %1830 }
0x1771   :  { %v1833_v20 = vmul.f32 %v1831_v19, %v1826_v17 }
0x1773   :  { %1835 = vrot.lane.b32.xlu1 %v1833_v20, %s3786_s26 }
0x17e5   :  { %v1836_v22 = vpop.permute.xlu1 %1835 }
0x17e6   :  { %v4270_v23 = vadd.f32 %v1836_v22, %v1828_v21 }
0x17e8   :  { %3707 = vtanh.f32 %v4270_v23 }
0x17f2   :  { %v3708_v38 = vpop.eup %3707 }
0x17f3   :  { %1841 = vrot.lane.b32.xlu0 %v3708_v38, %s3786_s26 }
0x1865   :  { %v1842_v39 = vpop.permute.xlu0 %1841 }
0x1866   :  { %v4314_v11 = vmul.f32 %v1842_v39, %v1826_v17 }
0x1868   :  { %1861 = vrot.lane.b32.xlu1 %v4314_v11, %s3790_s22 }
0x18da   :  { %v1862_v14 = vpop.permute.xlu1 %1861 }
0x18db   :  { %v1864_v40 = vsel %vm149_vm1, %v1743_v0, %v1862_v14 }
0x18dc   :  { %3204 = vmatmul.mubr.msk.f32.vlgmr.msra.gmra.mrb[16].mxu1 %vm251_vm2, %v1864_v40 }
0x18dd   :  { %3509 = vmatpush3.bf16.msra.mxu1 %v4282_v25  ;;  %3241 = vmatprep.mubr.msk.f32.mxu1 %vm3783_vm0, %v3784_v7 }
0x18de   :  { %3510 = vmatprep.subr.bf16.mxu1 %v3782_v4 }
0x18e1   :  { %3512 = vmatpush3.bf16.msra.mxu1 %v4288_v28 }
0x18e2   :  { %3513 = vmatprep.subr.bf16.mxu1 %v3782_v4 }
0x18e5   :  { %3515 = vmatpush3.bf16.msra.mxu1 %v4298_v33 }
0x18e6   :  { %3516 = vmatprep.subr.bf16.mxu1 %v3782_v4 }
0x18e9   :  { %3518 = vmatpush3.bf16.msra.mxu1 %v4309_v5 }
0x18ea   :  { %3531 = vmatprep.subr.bf16.mxu1 %v3782_v4 }
0x19af   :  { %v1934_v43 = vpop.f32.mrb[16].mxu1 }
0x19b0   :  { %v1935_v45 = vadd.f32 %v4333_v42, %v1934_v43  ;;  %v3205_v10 = vpop.f32.mrb[17].mxu1 }
0x19b2   :  { %3709 = vtanh.f32 %v1935_v45  ;;  %v1938_v47 = vmul.f32 0.5, %v1935_v45 }
0x19b4   :  { %3711 = vtanh.f32 %v1938_v47 }
0x19bc   :  { %v3710_v46 = vpop.eup %3709 }
0x19bd   :  { %1945 = vrot.lane.b32.xlu0 %v3710_v46, %s3786_s26 }
0x19be   :  { %v3712_v48 = vpop.eup %3711 }
0x19bf   :  { %v1940_v49 = vmul.f32 0.5, %v3712_v48 }
0x19c1   :  { %v1941_v51 = vadd.f32 0.5, %v1940_v49 }
0x19c3   :  { %v1943_v54 = vmul.f32 %v1941_v51, %v4245_v55 }
0x1a2f   :  { %v1946_v52 = vpop.permute.xlu0 %1945 }
0x1a30   :  { %v1948_v53 = vmul.f32 %v1946_v52, %v1941_v51 }
0x1a32   :  { %1950 = vrot.lane.b32.xlu1 %v1948_v53, %s3786_s26 }
0x1aa4   :  { %v1951_v57 = vpop.permute.xlu1 %1950 }
0x1aa5   :  { %v4339_v58 = vadd.f32 %v1951_v57, %v1943_v54 }
0x1aa7   :  { %3713 = vtanh.f32 %v4339_v58 }
0x1ab1   :  { %v3714_v59 = vpop.eup %3713 }
0x1ab2   :  { %1956 = vrot.lane.b32.xlu0 %v3714_v59, %s3786_s26 }
0x1b24   :  { %v1957_v61 = vpop.permute.xlu0 %1956 }
0x1b25   :  { %v1959_v62 = vmul.f32 %v1957_v61, %v1941_v51 }
0x1b27   :  { %1961 = vrot.lane.b32.xlu1 %v1959_v62, %s3788_s4 }
0x1b99   :  { %v1962_v63 = vpop.permute.xlu1 %1961 }
0x1b9a   :  { %v1964_v0 = vsel %vm149_vm1, %v1962_v63, %v1862_v14 }
0x1b9b   :  { %3223 = vmatmul.mubr.msk.f32.vlgmr.msra.gmra.mrb[16].mxu0 %vm251_vm2, %v1964_v0 }
0x1b9c   :  { %3521 = vmatpush3.bf16.msra.mxu0 %v3931_v32  ;;  %3260 = vmatprep.mubr.msk.f32.mxu0 %vm3783_vm0, %v3784_v7 }
0x1b9d   :  { %3522 = vmatprep.subr.bf16.mxu0 %v3782_v4 }
0x1ba0   :  { %3524 = vmatpush3.bf16.msra.mxu0 %v3937_v34 }
0x1ba1   :  { %3525 = vmatprep.subr.bf16.mxu0 %v3782_v4 }
0x1ba4   :  { %3527 = vmatpush3.bf16.msra.mxu0 %v3947_v37 }
0x1ba5   :  { %3528 = vmatprep.subr.bf16.mxu0 %v3782_v4 }
0x1ba8   :  { %3530 = vmatpush3.bf16.msra.mxu0 %v3958_v41 }
0x1ba9   :  { %3543 = vmatprep.subr.bf16.mxu0 %v3782_v4 }
0x1c6e   :  { %v2034_v55 = vpop.f32.mrb[16].mxu0 }
0x1c6f   :  { %v2035_v2 = vadd.f32 %v4359_v1, %v2034_v55  ;;  %v3224_v3 = vpop.f32.mrb[17].mxu0 }
0x1c71   :  { %3715 = vtanh.f32 %v2035_v2  ;;  %v2038_v12 = vmul.f32 0.5, %v2035_v2 }
0x1c73   :  { %3717 = vtanh.f32 %v2038_v12 }
0x1c7b   :  { %v3716_v9 = vpop.eup %3715 }
0x1c7c   :  { %2045 = vrot.lane.b32.xlu0 %v3716_v9, %s3786_s26 }
0x1c7d   :  { %v3718_v13 = vpop.eup %3717 }
0x1c7e   :  { %v2040_v15 = vmul.f32 0.5, %v3718_v13 }
0x1c80   :  { %v2041_v16 = vadd.f32 0.5, %v2040_v15 }
0x1c82   :  { %v2043_v20 = vmul.f32 %v2041_v16, %v4270_v23 }
0x1cee   :  { %v2046_v17 = vpop.permute.xlu0 %2045 }
0x1cef   :  { %v2048_v19 = vmul.f32 %v2046_v17, %v2041_v16 }
0x1cf1   :  { %2050 = vrot.lane.b32.xlu1 %v2048_v19, %s3786_s26 }
0x1d63   :  { %v2051_v21 = vpop.permute.xlu1 %2050 }
0x1d64   :  { %v4365_v22 = vadd.f32 %v2051_v21, %v2043_v20 }
0x1d66   :  { %3719 = vtanh.f32 %v4365_v22 }
0x1d70   :  { %v3720_v50 = vpop.eup %3719 }
0x1d71   :  { %2056 = vrot.lane.b32.xlu0 %v3720_v50, %s3786_s26 }
0x1de3   :  { %v2057_v8 = vpop.permute.xlu0 %2056 }
0x1de4   :  { %v4369_v24 = vmul.f32 %v2057_v8, %v2041_v16 }
0x1de6   :  { %2076 = vrot.lane.b32.xlu1 %v4369_v24, %s3790_s22 }
0x1e58   :  { %v2077_v27 = vpop.permute.xlu1 %2076 }
0x1e59   :  { %v2079_v29 = vsel %vm149_vm1, %v1962_v63, %v2077_v27 }
0x1e5a   :  { %3242 = vmatmul.mubr.msk.f32.vlgmr.msra.gmra.mrb[18].mxu1 %vm251_vm2, %v2079_v29 }
0x1e5b   :  { %3533 = vmatpush3.bf16.msra.mxu1 %v4282_v25  ;;  %3279 = vmatprep.mubr.msk.f32.mxu1 %vm3783_vm0, %v3784_v7 }
0x1e5c   :  { %3534 = vmatprep.subr.bf16.mxu1 %v3782_v4 }
0x1e5f   :  { %3536 = vmatpush3.bf16.msra.mxu1 %v4288_v28 }
0x1e60   :  { %3537 = vmatprep.subr.bf16.mxu1 %v3782_v4 }
0x1e63   :  { %3539 = vmatpush3.bf16.msra.mxu1 %v4298_v33 }
0x1e64   :  { %3540 = vmatprep.subr.bf16.mxu1 %v3782_v4 }
0x1e67   :  { %3542 = vmatpush3.bf16.msra.mxu1 %v4309_v5 }
0x1e68   :  { %3555 = vmatprep.subr.bf16.mxu1 %v3782_v4 }
0x1f2d   :  { %v2149_v23 = vpop.f32.mrb[18].mxu1 }
0x1f2e   :  { %v2150_v31 = vadd.f32 %v4333_v42, %v2149_v23  ;;  %v3243_v35 = vpop.f32.mrb[19].mxu1 }
0x1f30   :  { %3721 = vtanh.f32 %v2150_v31  ;;  %v2153_v38 = vmul.f32 0.5, %v2150_v31 }
0x1f32   :  { %3723 = vtanh.f32 %v2153_v38 }
0x1f3a   :  { %v3722_v36 = vpop.eup %3721 }
0x1f3b   :  { %2160 = vrot.lane.b32.xlu0 %v3722_v36, %s3786_s26 }
0x1f3c   :  { %v3724_v39 = vpop.eup %3723 }
0x1f3d   :  { %v2155_v14 = vmul.f32 0.5, %v3724_v39 }
0x1f3f   :  { %v2156_v40 = vadd.f32 0.5, %v2155_v14 }
0x1f41   :  { %v2158_v10 = vmul.f32 %v2156_v40, %v4339_v58 }
0x1fad   :  { %v2161_v43 = vpop.permute.xlu0 %2160 }
0x1fae   :  { %v2163_v45 = vmul.f32 %v2161_v43, %v2156_v40 }
0x1fb0   :  { %2165 = vrot.lane.b32.xlu1 %v2163_v45, %s3786_s26 }
0x2022   :  { %v2166_v46 = vpop.permute.xlu1 %2165 }
0x2023   :  { %v4389_v47 = vadd.f32 %v2166_v46, %v2158_v10 }
0x2025   :  { %3725 = vtanh.f32 %v4389_v47 }
0x202f   :  { %v3726_v48 = vpop.eup %3725 }
0x2030   :  { %2171 = vrot.lane.b32.xlu0 %v3726_v48, %s3786_s26 }
0x20a2   :  { %v2172_v49 = vpop.permute.xlu0 %2171 }
0x20a3   :  { %v2174_v51 = vmul.f32 %v2172_v49, %v2156_v40 }
0x20a5   :  { %2176 = vrot.lane.b32.xlu1 %v2174_v51, %s3788_s4 }
0x2117   :  { %v2177_v52 = vpop.permute.xlu1 %2176 }
0x2118   :  { %v2179_v53 = vsel %vm149_vm1, %v2177_v52, %v2077_v27 }
0x2119   :  { %3261 = vmatmul.mubr.msk.f32.vlgmr.msra.gmra.mrb[18].mxu0 %vm251_vm2, %v2179_v53 }
0x211a   :  { %3545 = vmatpush3.bf16.msra.mxu0 %v3931_v32  ;;  %3298 = vmatprep.mubr.msk.f32.mxu0 %vm3783_vm0, %v3784_v7 }
0x211b   :  { %3546 = vmatprep.subr.bf16.mxu0 %v3782_v4 }
0x211e   :  { %3548 = vmatpush3.bf16.msra.mxu0 %v3937_v34 }
0x211f   :  { %3549 = vmatprep.subr.bf16.mxu0 %v3782_v4 }
0x2122   :  { %3551 = vmatpush3.bf16.msra.mxu0 %v3947_v37 }
0x2123   :  { %3552 = vmatprep.subr.bf16.mxu0 %v3782_v4 }
0x2126   :  { %3554 = vmatpush3.bf16.msra.mxu0 %v3958_v41 }
0x2127   :  { %3567 = vmatprep.subr.bf16.mxu0 %v3782_v4 }
0x21ec   :  { %v2249_v54 = vpop.f32.mrb[18].mxu0 }
0x21ed   :  { %v2250_v57 = vadd.f32 %v4359_v1, %v2249_v54  ;;  %v3262_v58 = vpop.f32.mrb[19].mxu0 }
0x21ef   :  { %3727 = vtanh.f32 %v2250_v57  ;;  %v2253_v61 = vmul.f32 0.5, %v2250_v57 }
0x21f1   :  { %3729 = vtanh.f32 %v2253_v61 }
0x21f9   :  { %v3728_v59 = vpop.eup %3727 }
0x21fa   :  { %2260 = vrot.lane.b32.xlu0 %v3728_v59, %s3786_s26 }
0x21fb   :  { %v3730_v62 = vpop.eup %3729 }
0x21fc   :  { %v2255_v63 = vmul.f32 0.5, %v3730_v62 }
0x21fe   :  { %v2256_v0 = vadd.f32 0.5, %v2255_v63 }
0x2200   :  { %v2258_v3 = vmul.f32 %v2256_v0, %v4365_v22 }
0x226c   :  { %v2261_v55 = vpop.permute.xlu0 %2260 }
0x226d   :  { %v2263_v2 = vmul.f32 %v2261_v55, %v2256_v0 }
0x226f   :  { %2265 = vrot.lane.b32.xlu1 %v2263_v2, %s3786_s26 }
0x22e1   :  { %v2266_v9 = vpop.permute.xlu1 %2265 }
0x22e2   :  { %v4410_v12 = vadd.f32 %v2266_v9, %v2258_v3 }
0x22e4   :  { %3731 = vtanh.f32 %v4410_v12 }
0x22ee   :  { %v3732_v13 = vpop.eup %3731 }
0x22ef   :  { %2271 = vrot.lane.b32.xlu0 %v3732_v13, %s3786_s26 }
0x2361   :  { %v2272_v15 = vpop.permute.xlu0 %2271 }
0x2362   :  { %v4414_v16 = vmul.f32 %v2272_v15, %v2256_v0 }
0x2364   :  { %2291 = vrot.lane.b32.xlu1 %v4414_v16, %s3790_s22 }
0x23d6   :  { %v2292_v17 = vpop.permute.xlu1 %2291 }
0x23d7   :  { %v2294_v19 = vsel %vm149_vm1, %v2177_v52, %v2292_v17 }
0x23d8   :  { %3280 = vmatmul.mubr.msk.f32.vlgmr.msra.gmra.mrb[20].mxu1 %vm251_vm2, %v2294_v19  ;;  %v2736_v19 = vld [vmem:[%s4559_s8] ss:$0 sm:$0xff]  ;;  %s3796_s8 = smov 1  }
0x23d9   :  { %3557 = vmatpush3.bf16.msra.mxu1 %v4282_v25  ;;  %3317 = vmatprep.mubr.msk.f32.mxu1 %vm3783_vm0, %v3784_v7 }
0x23da   :  { %3558 = vmatprep.subr.bf16.mxu1 %v3782_v4 }
0x23dd   :  { %3560 = vmatpush3.bf16.msra.mxu1 %v4288_v28 }
0x23de   :  { %3561 = vmatprep.subr.bf16.mxu1 %v3782_v4 }
0x23e1   :  { %3563 = vmatpush3.bf16.msra.mxu1 %v4298_v33 }
0x23e2   :  { %3564 = vmatprep.subr.bf16.mxu1 %v3782_v4 }
0x23e5   :  { %3566 = vmatpush3.bf16.msra.mxu1 %v4309_v5 }
0x24ab   :  { %v2364_v20 = vpop.f32.mrb[20].mxu1 }
0x24ac   :  { %v2365_v21 = vadd.f32 %v4333_v42, %v2364_v20  ;;  %v3281_v22 = vpop.f32.mrb[21].mxu1 }
0x24ae   :  { %3733 = vtanh.f32 %v2365_v21  ;;  %v2368_v50 = vmul.f32 0.5, %v2365_v21 }
0x24b0   :  { %3735 = vtanh.f32 %v2368_v50 }
0x24b8   :  { %v3734_v25 = vpop.eup %3733 }
0x24b9   :  { %2375 = vrot.lane.b32.xlu0 %v3734_v25, %s3786_s26 }
0x24ba   :  { %v3736_v8 = vpop.eup %3735 }
0x24bb   :  { %v2370_v28 = vmul.f32 0.5, %v3736_v8 }
0x24bd   :  { %v2371_v27 = vadd.f32 0.5, %v2370_v28 }
0x24bf   :  { %v2373_v33 = vmul.f32 %v2371_v27, %v4389_v47 }
0x252b   :  { %v2376_v29 = vpop.permute.xlu0 %2375 }
0x252c   :  { %v2378_v23 = vmul.f32 %v2376_v29, %v2371_v27 }
0x252e   :  { %2380 = vrot.lane.b32.xlu1 %v2378_v23, %s3786_s26 }
0x25a0   :  { %v2381_v5 = vpop.permute.xlu1 %2380 }
0x25a1   :  { %v2383_v31 = vadd.f32 %v2381_v5, %v2373_v33 }
0x25a3   :  { %3737 = vtanh.f32 %v2383_v31 }
0x25ad   :  { %v3738_v35 = vpop.eup %3737 }
0x25ae   :  { %2386 = vrot.lane.b32.xlu0 %v3738_v35, %s3786_s26 }
0x2620   :  { %v2387_v36 = vpop.permute.xlu0 %2386 }
0x2621   :  { %v2389_v38 = vmul.f32 %v2387_v36, %v2371_v27 }
0x2623   :  { %2391 = vrot.lane.b32.xlu1 %v2389_v38, %s3788_s4 }
0x2695   :  { %v2392_v39 = vpop.permute.xlu1 %2391 }
0x2696   :  { %v2394_v14 = vsel %vm149_vm1, %v2392_v39, %v2292_v17 }
0x2697   :  { %3299 = vmatmul.mubr.msk.f32.vlgmr.msra.gmra.mrb[20].mxu0 %vm251_vm2, %v2394_v14  ;;  %v4487_v14 = vld [vmem:[#allocation2] ss:$0 sm:$0xff] }
0x2698   :  { %3569 = vmatpush3.bf16.msra.mxu0 %v3931_v32  ;;  %3336 = vmatprep.mubr.msk.f32.mxu0 %vm3783_vm0, %v3784_v7 }
0x2699   :  { %3570 = vmatprep.subr.bf16.mxu0 %v3782_v4 }
0x269c   :  { %3572 = vmatpush3.bf16.msra.mxu0 %v3937_v34 }
0x269d   :  { %3573 = vmatprep.subr.bf16.mxu0 %v3782_v4 }
0x26a0   :  { %3575 = vmatpush3.bf16.msra.mxu0 %v3947_v37 }
0x26a1   :  { %3576 = vmatprep.subr.bf16.mxu0 %v3782_v4 }
0x26a4   :  { %3578 = vmatpush3.bf16.msra.mxu0 %v3958_v41 }
0x276a   :  { %v2464_v40 = vpop.f32.mrb[20].mxu0 }
0x276b   :  { %v2465_v43 = vadd.f32 %v4359_v1, %v2464_v40  ;;  %v3300_v45 = vpop.f32.mrb[21].mxu0 }
0x276d   :  { %3739 = vtanh.f32 %v2465_v43  ;;  %v2468_v7 = vmul.f32 0.5, %v2465_v43 }
0x276f   :  { %3741 = vtanh.f32 %v2468_v7 }
0x2777   :  { %v3740_v32 = vpop.eup %3739 }
0x2778   :  { %2475 = vrot.lane.b32.xlu0 %v3740_v32, %s3786_s26 }
0x2779   :  { %v3742_v10 = vpop.eup %3741 }
0x277a   :  { %v2470_v34 = vmul.f32 0.5, %v3742_v10 }
0x277c   :  { %v2471_v46 = vadd.f32 0.5, %v2470_v34 }
0x277e   :  { %v2473_v4 = vmul.f32 %v2471_v46, %v4410_v12 }
0x27ea   :  { %v2476_v47 = vpop.permute.xlu0 %2475 }
0x27eb   :  { %v2478_v48 = vmul.f32 %v2476_v47, %v2471_v46 }
0x27ed   :  { %2480 = vrot.lane.b32.xlu1 %v2478_v48, %s3786_s26 }
0x285f   :  { %v2481_v37 = vpop.permute.xlu1 %2480 }
0x2860   :  { %v4450_v41 = vadd.f32 %v2481_v37, %v2473_v4 }
0x2862   :  { %3743 = vtanh.f32 %v4450_v41 }
0x286c   :  { %v3744_v49 = vpop.eup %3743 }
0x286d   :  { %2486 = vrot.lane.b32.xlu0 %v3744_v49, %s3786_s26 }
0x28df   :  { %v2487_v51 = vpop.permute.xlu0 %2486 }
0x28e0   :  { %v4454_v52 = vmul.f32 %v2487_v51, %v2471_v46 }
0x28e2   :  { %2506 = vrot.lane.b32.xlu1 %v4454_v52, %s3790_s22  ;;  %s3803_s22 = smov 7  }
0x2954   :  { %v2507_v53 = vpop.permute.xlu1 %2506 }
0x2955   :  { %v2509_v54 = vsel %vm149_vm1, %v2392_v39, %v2507_v53 }
0x2956   :  { %3318 = vmatmul.mubr.msk.f32.vlgmr.msra.gmra.mrb[22].mxu1 %vm251_vm2, %v2509_v54 }
0x2a29   :  { %v2579_v57 = vpop.f32.mrb[22].mxu1 }
0x2a2a   :  { %v2580_v58 = vadd.f32 %v4333_v42, %v2579_v57  ;;  %v3319_v59 = vpop.f32.mrb[23].mxu1 }
0x2a2c   :  { %3745 = vtanh.f32 %v2580_v58  ;;  %v2583_v62 = vmul.f32 0.5, %v2580_v58 }
0x2a2e   :  { %3747 = vtanh.f32 %v2583_v62 }
0x2a36   :  { %v3746_v61 = vpop.eup %3745 }
0x2a37   :  { %2590 = vrot.lane.b32.xlu0 %v3746_v61, %s3786_s26 }
0x2a38   :  { %v3748_v63 = vpop.eup %3747 }
0x2a39   :  { %v2585_v0 = vmul.f32 0.5, %v3748_v63 }
0x2a3b   :  { %v2586_v55 = vadd.f32 0.5, %v2585_v0 }
0x2a3d   :  { %v2588_v9 = vmul.f32 %v2586_v55, %v2383_v31 }
0x2aa9   :  { %v2591_v2 = vpop.permute.xlu0 %2590 }
0x2aaa   :  { %v2593_v3 = vmul.f32 %v2591_v2, %v2586_v55 }
0x2aac   :  { %2595 = vrot.lane.b32.xlu1 %v2593_v3, %s3786_s26 }
0x2b1e   :  { %v2596_v12 = vpop.permute.xlu1 %2595 }
0x2b1f   :  { %v2598_v13 = vadd.f32 %v2596_v12, %v2588_v9 }
0x2b21   :  { %3749 = vtanh.f32 %v2598_v13 }
0x2b2b   :  { %v3750_v15 = vpop.eup %3749 }
0x2b2c   :  { %2601 = vrot.lane.b32.xlu0 %v3750_v15, %s3786_s26 }
0x2b9e   :  { %v2602_v42 = vpop.permute.xlu0 %2601 }
0x2b9f   :  { %v2604_v17 = vmul.f32 %v2602_v42, %v2586_v55 }
0x2ba1   :  { %2606 = vrot.lane.b32.xlu1 %v2604_v17, %s3788_s4 }
0x2ba5   :  { %347 = vrot.lane.b32.xlu1 %v2736_v19, %s3788_s4 }
0x2c13   :  { %v2607_v20 = vpop.permute.xlu1 %2606 }
0x2c14   :  { %v2609_v21 = vsel %vm149_vm1, %v2607_v20, %v2507_v53 }
0x2c15   :  { %3337 = vmatmul.mubr.msk.f32.vlgmr.msra.gmra.mrb[22].mxu0 %vm251_vm2, %v2609_v21 }
0x2c17   :  { %v4472_v28 = vpop.permute.xlu1 %347 }
0x2c18   :  { %v350_v27 = vmul.f32 %v4472_v28, %v4005_v26  ;;  %v561_v29 = vmul.f32 %v4047_v6, %v4472_v28  ;;  %v775_v6 = vmul.f32 %v4089_v56, %v4472_v28  ;;  %v1203_v47 = vmul.f32 %v4173_v30, %v4472_v28 }
0x2c19   :  { %v989_v53 = vmul.f32 %v4131_v44, %v4472_v28  ;;  %v1631_v30 = vmul.f32 %v4250_v60, %v4472_v28  ;;  %v1845_v54 = vmul.f32 %v4314_v11, %v4472_v28  ;;  %v2275_v57 = vmul.f32 %v4414_v16, %v4472_v28 }
0x2c1a   :  { %v2490_v59 = vmul.f32 %v4454_v52, %v4472_v28  ;;  %v1417_v55 = vmul.f32 %v4215_v18, %v4472_v28  ;;  %v2060_v13 = vmul.f32 %v4369_v24, %v4472_v28 }
0x2ce8   :  { %v2679_v22 = vpop.f32.mrb[22].mxu0 }
0x2ce9   :  { %v2680_v25 = vadd.f32 %v4359_v1, %v2679_v22  ;;  %v3338_v50 = vpop.f32.mrb[23].mxu0 }
0x2ceb   :  { %3751 = vtanh.f32 %v2680_v25  ;;  %v2683_v23 = vmul.f32 0.5, %v2680_v25 }
0x2ced   :  { %3753 = vtanh.f32 %v2683_v23 }
0x2cf5   :  { %v3752_v8 = vpop.eup %3751 }
0x2cf6   :  { %2690 = vrot.lane.b32.xlu0 %v3752_v8, %s3786_s26 }
0x2cf7   :  { %v3754_v1 = vpop.eup %3753 }
0x2cf8   :  { %v2685_v33 = vmul.f32 0.5, %v3754_v1 }
0x2cfa   :  { %352 = vrot.lane.b32.xlu0 %v350_v27, %s3788_s4  ;;  %v2686_v5 = vadd.f32 0.5, %v2685_v33 }
0x2cfc   :  { %v2688_v56 = vmul.f32 %v2686_v5, %v4450_v41 }
0x2cfe   :  { %563 = vrot.lane.b32.xlu0 %v561_v29, %s3788_s4 }
0x2d68   :  { %v2691_v31 = vpop.permute.xlu0 %2690 }
0x2d69   :  { %v2693_v35 = vmul.f32 %v2691_v31, %v2686_v5 }
0x2d6b   :  { %2695 = vrot.lane.b32.xlu0 %v2693_v35, %s3786_s26 }
0x2d6c   :  { %v353_v36 = vpop.permute.xlu0 %352 }
0x2d6d   :  { %v356_v26 = vsel %vm355_vm3, %v353_v36, 0.0 }
0x2d6e   :  { %357 = vadd.xlane.f32.xlu1 %v356_v26 }
0x2d70   :  { %v564_v38 = vpop.permute.xlu0 %563 }
0x2d71   :  { %v566_v39 = vsel %vm355_vm3, %v564_v38, 0.0 }
0x2d8a   :  { %567 = vadd.xlane.f32.xlu0 %v566_v39 }
0x2da0   :  { %777 = vrot.lane.b32.xlu0 %v775_v6, %s3788_s4 }
0x2ddd   :  { %v2696_v45 = vpop.permute.xlu0 %2695 }
0x2dde   :  { %v2698_v46 = vadd.f32 %v2696_v45, %v2688_v56 }
0x2de0   :  { %3755 = vtanh.f32 %v2698_v46 }
0x2dea   :  { %v3756_v48 = vpop.eup %3755 }
0x2dfb   :  { %v358_v40 = vpop.xlane.xlu1 %357 }
0x2dfc   :  { %v359_v43 = vadd.f32 %v4487_v14, %v358_v40 }
0x2dfe   :  { %361 = vst.msk [vmem:[#allocation3] sm:$0xf] %vm360_vm4, %v359_v43 }
0x2e17   :  { %v568_v32 = vpop.xlane.xlu0 %567 }
0x2e18   :  { %v569_v7 = vadd.f32 %v4487_v14, %v568_v32 }
0x2e1a   :  { %571 = vrot.lane.b32.xlu1 %v569_v7, %s3796_s8 }
0x2e1b   :  { %v778_v10 = vpop.permute.xlu0 %777 }
0x2e1c   :  { %v780_v34 = vsel %vm355_vm3, %v778_v10, 0.0 }
0x2e3e   :  { %781 = vadd.xlane.f32.xlu1 %v780_v34 }
0x2e4f   :  { %1205 = vrot.lane.b32.xlu1 %v1203_v47, %s3788_s4 }
0x2e53   :  { %2701 = vrot.lane.b32.xlu1 %v3756_v48, %s3786_s26  ;;  %s3798_s26 = smov 3  }
0x2e8c   :  { %v572_v4 = vpop.permute.xlu1 %571 }
0x2e8d   :  { %575 = vst.msk [vmem:[#allocation3] sm:$0xf] %vm574_vm5, %v572_v4 }
0x2ecb   :  { %v782_v37 = vpop.xlane.xlu1 %781 }
0x2ecc   :  { %v783_v49 = vadd.f32 %v4487_v14, %v782_v37 }
0x2ece   :  { %785 = vrot.lane.b32.xlu0 %v783_v49, %s3797_s19 }
0x2ecf   :  { %v1206_v51 = vpop.permute.xlu1 %1205 }
0x2ed0   :  { %v1208_v41 = vsel %vm355_vm3, %v1206_v51, 0.0 }
0x2ed1   :  { %1209 = vadd.xlane.f32.xlu1 %v1208_v41 }
0x2ed2   :  { %991 = vrot.lane.b32.xlu0 %v989_v53, %s3788_s4 }
0x2ed3   :  { %v2702_v58 = vpop.permute.xlu1 %2701 }
0x2ed4   :  { %v2704_v44 = vmul.f32 %v2702_v58, %v2686_v5 }
0x2ed6   :  { %v2705_v60 = vmul.f32 %v2704_v44, %v4472_v28 }
0x2ee2   :  { %1633 = vrot.lane.b32.xlu1 %v1631_v30, %s3788_s4 }
0x2ee6   :  { %1847 = vrot.lane.b32.xlu1 %v1845_v54, %s3788_s4 }
0x2eea   :  { %2277 = vrot.lane.b32.xlu1 %v2275_v57, %s3788_s4 }
0x2eee   :  { %2492 = vrot.lane.b32.xlu1 %v2490_v59, %s3788_s4 }
0x2ef2   :  { %2707 = vrot.lane.b32.xlu1 %v2705_v60, %s3788_s4 }
0x2f40   :  { %v786_v11 = vpop.permute.xlu0 %785 }
0x2f41   :  { %789 = vst.msk [vmem:[#allocation3] sm:$0xf] %vm788_vm6, %v786_v11 }
0x2f44   :  { %v992_v61 = vpop.permute.xlu0 %991 }
0x2f45   :  { %v994_v62 = vsel %vm355_vm3, %v992_v61, 0.0 }
0x2f46   :  { %995 = vadd.xlane.f32.xlu0 %v994_v62 }
0x2f5e   :  { %v1210_v0 = vpop.xlane.xlu1 %1209 }
0x2f5f   :  { %v1211_v52 = vadd.f32 %v4487_v14, %v1210_v0 }
0x2f62   :  { %v1634_v42 = vpop.permute.xlu1 %1633 }
0x2f63   :  { %v1636_v20 = vsel %vm355_vm3, %v1634_v42, 0.0 }
0x2f66   :  { %v1848_v17 = vpop.permute.xlu1 %1847 }
0x2f67   :  { %v1850_v29 = vsel %vm355_vm3, %v1848_v17, 0.0 }
0x2f6a   :  { %v2278_v19 = vpop.permute.xlu1 %2277 }
0x2f6b   :  { %v2280_v23 = vsel %vm355_vm3, %v2278_v19, 0.0 }
0x2f6e   :  { %v2493_v25 = vpop.permute.xlu1 %2492 }
0x2f6f   :  { %v2495_v24 = vsel %vm355_vm3, %v2493_v25, 0.0 }
0x2f72   :  { %v2708_v50 = vpop.permute.xlu1 %2707 }
0x2f73   :  { %v2710_v1 = vsel %vm355_vm3, %v2708_v50, 0.0 }
0x2fd3   :  { %v996_v16 = vpop.xlane.xlu0 %995 }
0x2fd4   :  { %v997_v63 = vadd.f32 %v4487_v14, %v996_v16 }
0x2fd6   :  { %999 = vrot.lane.b32.xlu0 %v997_v63, %s3798_s26 }
0x2fda   :  { %1213 = vrot.lane.b32.xlu0 %v1211_v52, %s3799_s20 }
0x2fde   :  { %1419 = vrot.lane.b32.xlu0 %v1417_v55, %s3788_s4 }
0x3048   :  { %v1000_v2 = vpop.permute.xlu0 %999 }
0x3049   :  { %1003 = vst.msk [vmem:[#allocation3] sm:$0xf] %vm1002_vm7, %v1000_v2 }
0x304c   :  { %v1214_v3 = vpop.permute.xlu0 %1213 }
0x304d   :  { %1217 = vst.msk [vmem:[#allocation3] sm:$0xf] %vm1216_vm8, %v1214_v3 }
0x3050   :  { %v1420_v9 = vpop.permute.xlu0 %1419 }
0x3051   :  { %v1422_v12 = vsel %vm355_vm3, %v1420_v9, 0.0 }
0x3052   :  { %1423 = vadd.xlane.f32.xlu0 %v1422_v12 }
0x3068   :  { %2062 = vrot.lane.b32.xlu0 %v2060_v13, %s3788_s4  ;;  %s3801_s4 = smov 6  }
0x30df   :  { %v1424_v15 = vpop.xlane.xlu0 %1423 }
0x30e0   :  { %v1425_v18 = vadd.f32 %v4487_v14, %v1424_v15 }
0x30e2   :  { %1427 = vrot.lane.b32.xlu1 %v1425_v18, %s3800_s21 }
0x30e3   :  { %v2063_v21 = vpop.permute.xlu0 %2062 }
0x30e4   :  { %v2065_v22 = vsel %vm355_vm3, %v2063_v21, 0.0 }
0x3106   :  { %1637 = vadd.xlane.f32.xlu1 %v1636_v20 }
0x310a   :  { %2066 = vadd.xlane.f32.xlu1 %v2065_v22 }
0x310e   :  { %2496 = vadd.xlane.f32.xlu1 %v2495_v24 }
0x3154   :  { %v1428_v8 = vpop.permute.xlu1 %1427 }
0x3155   :  { %1431 = vst.msk [vmem:[#allocation3] sm:$0xf] %vm1430_vm9, %v1428_v8 }
0x3193   :  { %v1638_v28 = vpop.xlane.xlu1 %1637 }
0x3194   :  { %v1639_v27 = vadd.f32 %v4487_v14, %v1638_v28 }
0x3196   :  { %1641 = vrot.lane.b32.xlu0 %v1639_v27, %s3801_s4 }
0x3197   :  { %v2067_v33 = vpop.xlane.xlu1 %2066 }
0x3198   :  { %v2068_v5 = vadd.f32 %v4487_v14, %v2067_v33 }
0x319b   :  { %v2497_v39 = vpop.xlane.xlu1 %2496 }
0x319c   :  { %v2498_v40 = vadd.f32 %v4487_v14, %v2497_v39 }
0x31b5   :  { %1851 = vadd.xlane.f32.xlu0 %v1850_v29 }
0x31b9   :  { %2281 = vadd.xlane.f32.xlu0 %v2280_v23 }
0x31bd   :  { %2711 = vadd.xlane.f32.xlu0 %v2710_v1 }
0x31d3   :  { %2070 = vrot.lane.b32.xlu0 %v2068_v5, %s3802_s9 }
0x3208   :  { %v1642_v31 = vpop.permute.xlu0 %1641 }
0x3209   :  { %1645 = vst.msk [vmem:[#allocation3] sm:$0xf] %vm1644_vm10, %v1642_v31 }
0x3242   :  { %v1852_v35 = vpop.xlane.xlu0 %1851 }
0x3243   :  { %v1853_v36 = vadd.f32 %v4487_v14, %v1852_v35 }
0x3245   :  { %1855 = vrot.lane.b32.xlu1 %v1853_v36, %s3803_s22 }
0x3246   :  { %v2282_v26 = vpop.xlane.xlu0 %2281 }
0x3247   :  { %v2283_v38 = vadd.f32 %v4487_v14, %v2282_v26 }
0x3249   :  { %2285 = vrot.lane.b32.xlu1 %v2283_v38, %s3804_s23 }
0x324a   :  { %v2712_v6 = vpop.xlane.xlu0 %2711 }
0x324b   :  { %v2713_v43 = vadd.f32 %v4487_v14, %v2712_v6 }
0x324d   :  { %2715 = vrot.lane.b32.xlu0 %v2713_v43, %s3805_s0  ;;  %2500 = vrot.lane.b32.xlu1 %v2498_v40, %s3806_s2 }
0x324e   :  { %v2071_v32 = vpop.permute.xlu0 %2070 }
0x32b7   :  { %v1856_v45 = vpop.permute.xlu1 %1855 }
0x32b8   :  { %1859 = vst.msk [vmem:[#allocation3] sm:$0xf] %vm1858_vm11, %v1856_v45 }
0x32b9   :  { %2074 = vst.msk [vmem:[#allocation3] sm:$0xf] %vm2073_vm12, %v2071_v32 }
0x32bb   :  { %v2286_v7 = vpop.permute.xlu1 %2285 }
0x32bc   :  { %2289 = vst.msk [vmem:[#allocation3] sm:$0xf] %vm2288_vm13, %v2286_v7 }
0x32bf   :  { %v2716_v10 = vpop.permute.xlu0 %2715  ;;  %v2501_v34 = vpop.permute.xlu1 %2500 }
0x32c0   :  { %2504 = vst.msk [vmem:[#allocation3] sm:$0xf] %vm2503_vm14, %v2501_v34 }
0x32c1   :  { %2719 = vst.msk [vmem:[#allocation3] sm:$0xf] %vm2718_vm15, %v2716_v10 }
0x32c2   :  { %3769 = shalt.err (!%p3766_p4)
}
0x32c3   :  { %s3770_s28 = scalar_lea.hbm %s4561_s10, 64 }
0x32c4   :  { %p3771_p5 = scmp.ne.s32.totalorder %s4561_s10, %s3770_s28  ;;  %p3774_p6 = scmp.lt.u32.totalorder %s3770_s28, %s4561_s10 }
0x32c6   :  { %p3776_p7 = pnand %p3774_p6, %p3771_p5 }
0x32c8   :  { %3779 = shalt.err (!%p3776_p7)
}
0x32c9   :  { %2729 = dma.vmem_to_hbm [thread:$0]  %s2727_s25, 64, %s4561_s10, [#allocation4]  }
0x32ca   :  { %3780 = dma.done.wait [#allocation4], 64  }
0x32cb   :  { %3781 = vsyncadd [#allocation4], 4294967232 }
0x32cc   :  { %2733 = vsyncpa [#allocation4], 1 }

</bundles_post_ra>
